<compile_context>
chip_gen: v6e
topology: v6e:2x2x1
jax: 0.10.0
libtpu: 0.0.40
codegen_flags: <defaults>
</compile_context>

<pallas_src>
import functools

import jax
import jax.numpy as jnp
from jax.experimental import pallas as pl
from jax.experimental.pallas import tpu as pltpu

LN_EPS = 1e-5          # torch.nn.LayerNorm default eps


def _sublane_multiple(dtype):
    """Minimum sublane tile multiple for a dtype (8 f32 / 16 bf16 / 32 int8)."""
    return max(8, 32 // jnp.dtype(dtype).itemsize)


def _pick_tile(total, preferred, multiple):
    """Largest tile <= preferred that divides `total` and is a multiple of
    `multiple`; falls back to the full extent (always a legal block dim)."""
    hi = min(preferred, total)
    for cand in range(hi, 0, -1):
        if total % cand == 0 and cand % multiple == 0:
            return cand
    return total


def _flash_attention_kernel(q_ref, kt_ref, v_ref, qn_ref, nrm_ref, pwt_ref,
                            o_ref, m_ref, l_ref, acc_ref, qs_ref, xn_ref,
                            *, num_heads, head_dim, ln_eps, exp_dtype):
    h = pl.program_id(2)           # head index      (arbitrary axis)
    ki = pl.program_id(3)          # kv-tile index   (arbitrary axis, innermost)
    nk = pl.num_programs(3)
    cdt = q_ref.dtype              # compute / MXU dtype = input dtype
    f32 = jnp.float32

    # ---- Q-LayerNorm (scale pre-folded into weight/bias) computed ONCE per
    #      (b, q-tile, head) at the first KV step, cached in compute dtype.
    @pl.when(ki == 0)
    def _():
        q = q_ref[0, 0].astype(f32)                              # (tq, hd)
        qw = qn_ref[0:1, :].astype(f32)                          # (1, hd)  (scale folded)
        qb = qn_ref[1:2, :].astype(f32)
        qm = jnp.mean(q, axis=-1, keepdims=True)
        qc = q - qm
        qv = jnp.mean(qc * qc, axis=-1, keepdims=True)
        qs_ref[...] = (qc * jax.lax.rsqrt(qv + ln_eps) * qw + qb).astype(cdt)

    # ---- scores: K is already LayerNormed + transposed in the wrapper, so this
    #      is a plain (tq,hd)@(hd,tk) MXU feed with the KV sequence lane-dense.
    s = jnp.dot(qs_ref[...], kt_ref[0, 0], preferred_element_type=f32)   # (tq, tk)
    v = v_ref[0, 0]                                                      # (tk, hd)

    # ---- online softmax: first KV step writes directly (no zero-init pass).
    @pl.when(ki == 0)
    def _():
        m_new = jnp.max(s, axis=-1, keepdims=True)                       # (tq, 1)
        p = jnp.exp((s - m_new).astype(exp_dtype))                       # (tq, tk)
        m_ref[...] = m_new
        l_ref[...] = jnp.sum(p.astype(f32), axis=-1, keepdims=True)
        acc_ref[h] = jnp.dot(p.astype(cdt), v, preferred_element_type=f32)

    @pl.when(ki > 0)
    def _():
        m_prev = m_ref[...]
        m_new = jnp.maximum(m_prev, jnp.max(s, axis=-1, keepdims=True))
        alpha = jnp.exp(m_prev - m_new)                                  # (tq, 1)
        p = jnp.exp((s - m_new).astype(exp_dtype))
        m_ref[...] = m_new
        l_ref[...] = alpha * l_ref[...] + jnp.sum(p.astype(f32), axis=-1, keepdims=True)
        acc_ref[h] = acc_ref[h] * alpha + jnp.dot(p.astype(cdt), v,
                                                  preferred_element_type=f32)

    # ---- per-head finalize: fold 1/l into the accumulator (EUP approx recip).
    @pl.when(ki == nk - 1)
    def _():
        acc_ref[h] = acc_ref[h] * pl.reciprocal(l_ref[...], approx=True)

    # ---- all heads done for this (batch, q-tile): fused head-merge +
    #      LayerNorm(dim) + output projection.  Head slabs are re-read from the
    #      acc scratch one at a time (no H live f32 slabs -> no vreg spills);
    #      the projection is a single full-depth (tq,D)@(D,D) matmul.
    @pl.when((ki == nk - 1) & (h == num_heads - 1))
    def _():
        H, hd = num_heads, head_dim
        inv_dim = 1.0 / (H * hd)

        ssum = acc_ref[0].sum(axis=-1, keepdims=True)
        for hh in range(1, H):
            ssum = ssum + acc_ref[hh].sum(axis=-1, keepdims=True)
        mu = ssum * inv_dim                                              # (tq, 1)

        ssq = None
        for hh in range(H):
            c = acc_ref[hh] - mu
            sq = (c * c).sum(axis=-1, keepdims=True)
            ssq = sq if ssq is None else ssq + sq
        inv = jax.lax.rsqrt(ssq * inv_dim + ln_eps)                      # (tq, 1)

        for hh in range(H):
            nw = nrm_ref[0:1, hh * hd:(hh + 1) * hd].astype(f32)         # (1, hd)
            nb = nrm_ref[1:2, hh * hd:(hh + 1) * hd].astype(f32)
            xn = ((acc_ref[hh] - mu) * inv) * nw + nb                    # (tq, hd)
            xn_ref[:, hh * hd:(hh + 1) * hd] = xn.astype(xn_ref.dtype)

        y = jnp.dot(xn_ref[...], pwt_ref[...], preferred_element_type=f32)   # (tq, D)
        o_ref[0] = y.astype(o_ref.dtype)


def attention_forward(x_q, x_k, x_v, params, num_heads=1, *,
                      tq=512, tk=256, exp_in_bf16=None,
                      vmem_limit_bytes=40 * 1024 * 1024):
    """Pallas flash-attention implementation of Attention.forward (default config)."""
    if x_q.ndim == 2:
        x_q = x_q[:, None, :]
    assert x_q.ndim == 3
    B, S, D = x_q.shape
    _, N, _ = x_k.shape
    assert D % num_heads == 0
    H = num_heads
    hd = D // H
    scale = hd ** (-0.5)
    cdt = x_q.dtype
    f32 = jnp.float32

    # --- glue: mirror the torch reshapes exactly.
    q = x_q.reshape(B, H, -1, hd)                                   # (B, H, S, hd)
    S_eff = q.shape[2]
    # K-LayerNorm folded into the transpose pass (done once per K element, in
    # f32), producing lane-dense K^T tiles in the compute dtype.
    kf = x_k.astype(f32).reshape(B, N, H, hd)
    km = jnp.mean(kf, axis=-1, keepdims=True)
    kc = kf - km
    kvar = jnp.mean(kc * kc, axis=-1, keepdims=True)
    kn = kc * jax.lax.rsqrt(kvar + LN_EPS) * params['k_norm_w'] + params['k_norm_b']
    kt = jnp.transpose(kn, (0, 2, 3, 1)).astype(cdt)                # (B, H, hd, N)
    v = jnp.transpose(x_v.reshape(B, N, H, hd), (0, 2, 1, 3))       # (B, H, N, hd)

    tq_ = _pick_tile(S_eff, tq, _sublane_multiple(cdt))
    tk_ = _pick_tile(N, tk, 128)

    # q_norm params with the attention scale folded in (saves a per-tile mul).
    qn_params = jnp.stack([params['q_norm_w'] * scale,
                           params['q_norm_b'] * scale]).astype(f32)         # (2, hd)
    nrm_params = jnp.stack([params['norm_w'], params['norm_b']]).astype(f32)  # (2, D)
    # Projection weight: pre-transposed and pre-cast to the compute dtype.
    pwt = params['proj_w'].T.astype(cdt)                                      # (D, D)

    if exp_in_bf16 is None:
        exp_in_bf16 = (hd <= 64) and (cdt == jnp.bfloat16)
    exp_dtype = jnp.bfloat16 if exp_in_bf16 else f32

    kernel = functools.partial(_flash_attention_kernel, num_heads=H,
                               head_dim=hd, ln_eps=LN_EPS, exp_dtype=exp_dtype)

    grid = (B, S_eff // tq_, H, N // tk_)

    out = pl.pallas_call(
        kernel,
        out_shape=jax.ShapeDtypeStruct((B, S_eff, D), x_q.dtype),
        grid_spec=pltpu.PrefetchScalarGridSpec(
            num_scalar_prefetch=0,
            grid=grid,
            in_specs=[
                pl.BlockSpec((1, 1, tq_, hd), lambda b, qi, h, ki: (b, h, qi, 0)),   # q
                pl.BlockSpec((1, 1, hd, tk_), lambda b, qi, h, ki: (b, h, 0, ki)),   # k^T (normed)
                pl.BlockSpec((1, 1, tk_, hd), lambda b, qi, h, ki: (b, h, ki, 0)),   # v
                pl.BlockSpec((2, hd), lambda b, qi, h, ki: (0, 0)),                  # q_norm w/b (scaled)
                pl.BlockSpec((2, D), lambda b, qi, h, ki: (0, 0)),                   # norm(dim) w/b
                pl.BlockSpec((D, D), lambda b, qi, h, ki: (0, 0)),                   # proj W^T
            ],
            out_specs=pl.BlockSpec((1, tq_, D), lambda b, qi, h, ki: (b, qi, 0)),
            scratch_shapes=[
                pltpu.VMEM((tq_, 1), jnp.float32),       # running max  m
                pltpu.VMEM((tq_, 1), jnp.float32),       # running sum  l
                pltpu.VMEM((H, tq_, hd), jnp.float32),   # per-head output accumulator
                pltpu.VMEM((tq_, hd), cdt),              # cached normalized+scaled Q
                pltpu.VMEM((tq_, D), cdt),               # staged LayerNorm(dim) output
            ],
        ),
        compiler_params=pltpu.CompilerParams(
            dimension_semantics=("parallel", "parallel", "arbitrary", "arbitrary"),
            vmem_limit_bytes=vmem_limit_bytes,
        ),
    )(q, kt, v, qn_params, nrm_params, pwt)
    return out


# ----------------------------- reference & test -----------------------------

def _layernorm_ref(x, w, b, eps=LN_EPS):
    m = jnp.mean(x, axis=-1, keepdims=True)
    c = x - m
    var = jnp.mean(c * c, axis=-1, keepdims=True)
    return c * jax.lax.rsqrt(var + eps) * w + b


def attention_reference(x_q, x_k, x_v, params, num_heads=1):
    """Pure-JAX reference mirroring the torch forward, for verification."""
    if x_q.ndim == 2:
        x_q = x_q[:, None, :]
    B, S, D = x_q.shape
    _, N, _ = x_k.shape
    hd = D // num_heads
    scale = hd ** (-0.5)
    q = x_q.reshape(B, num_heads, -1, hd)
    k = jnp.transpose(x_k.reshape(B, N, num_heads, hd), (0, 2, 1, 3))
    v = jnp.transpose(x_v.reshape(B, N, num_heads, hd), (0, 2, 1, 3))
    q = _layernorm_ref(q, params['q_norm_w'], params['q_norm_b']) * scale
    k = _layernorm_ref(k, params['k_norm_w'], params['k_norm_b'])
    attn = jnp.einsum('bhsd,bhnd->bhsn', q, k)
    attn = jax.nn.softmax(attn, axis=-1)
    x = jnp.einsum('bhsn,bhnd->bhsd', attn, v)
    x = jnp.transpose(x, (0, 2, 1, 3)).reshape(B, -1, D)
    x = _layernorm_ref(x, params['norm_w'], params['norm_b'])
    return x @ params['proj_w'].T


def init_params(key, dim, num_heads=1):
    """Parameters matching the module (proj: xavier_uniform, no bias).  LN params
    are lightly perturbed from torch's ones/zeros default so the test exercises
    the weight/bias application paths."""
    hd = dim // num_heads
    k_proj, k_ln = jax.random.split(key)
    bound = (6.0 / (dim + dim)) ** 0.5
    proj_w = jax.random.uniform(k_proj, (dim, dim), jnp.float32, -bound, bound)
    ks = jax.random.split(k_ln, 6)
    w = lambda kk, n: 1.0 + 0.1 * jax.random.normal(kk, (n,), jnp.float32)
    b = lambda kk, n: 0.1 * jax.random.normal(kk, (n,), jnp.float32)
    return {
        'q_norm_w': w(ks[0], hd), 'q_norm_b': b(ks[1], hd),
        'k_norm_w': w(ks[2], hd), 'k_norm_b': b(ks[3], hd),
        'norm_w':   w(ks[4], dim), 'norm_b':  b(ks[5], dim),
        'proj_w': proj_w,
    }


if __name__ == "__main__":
    key = jax.random.PRNGKey(0)

    def run_case(case_key, B, S, N, D, H, tq, tk, tol):
        kq, kk, kv, kp = jax.random.split(case_key, 4)
        x_q = jax.random.normal(kq, (B, S, D), jnp.float32)
        x_k = jax.random.normal(kk, (B, N, D), jnp.float32)
        x_v = jax.random.normal(kv, (B, N, D), jnp.float32)
        params = init_params(kp, D, H)
        out = attention_forward(x_q, x_k, x_v, params, num_heads=H, tq=tq, tk=tk)
        out = jax.block_until_ready(out)
        ref = attention_reference(x_q, x_k, x_v, params, num_heads=H)
        assert out.shape == (B, S, D)
        assert jnp.allclose(out, ref, atol=tol, rtol=tol), \
            f"max abs err = {jnp.max(jnp.abs(out - ref))}"

    k1, k2 = jax.random.split(key)
    # default module config (num_heads=1); grid (2 batches x 2 q-tiles x 2 kv-tiles)
    run_case(k1, B=2, S=128, N=256, D=128, H=1, tq=64, tk=128, tol=2e-2)
    # multi-head config exercising the head axis + fused head-merge/norm/proj epilogue
    run_case(k2, B=2, S=64, N=256, D=128, H=4, tq=32, tk=128, tol=2e-2)

    print("KERNEL_OK")
</pallas_src>

<mosaic_0001>
module attributes {stable_mosaic.version = 11 : i64} {
  func.func @_flash_attention_kernel(%arg0: i32, %arg1: i32, %arg2: i32, %arg3: i32, %arg4: memref<1x1x64x128xf32, #tpu.memory_space<vmem>>, %arg5: memref<1x1x128x128xf32, #tpu.memory_space<vmem>>, %arg6: memref<1x1x128x128xf32, #tpu.memory_space<vmem>>, %arg7: memref<2x128xf32, #tpu.memory_space<vmem>>, %arg8: memref<2x128xf32, #tpu.memory_space<vmem>>, %arg9: memref<128x128xf32, #tpu.memory_space<vmem>>, %arg10: memref<1x64x128xf32, #tpu.memory_space<vmem>>, %arg11: memref<64x1xf32, #tpu.memory_space<vmem>>, %arg12: memref<64x1xf32, #tpu.memory_space<vmem>>, %arg13: memref<1x64x128xf32, #tpu.memory_space<vmem>>, %arg14: memref<64x128xf32, #tpu.memory_space<vmem>>, %arg15: memref<64x128xf32, #tpu.memory_space<vmem>>) attributes {dimension_semantics = [#tpu.dimension_semantics<parallel>, #tpu.dimension_semantics<parallel>, #tpu.dimension_semantics<arbitrary>, #tpu.dimension_semantics<arbitrary>], iteration_bounds = array<i64: 2, 2, 1, 2>, scalar_prefetch = 0 : i64, scratch_operands = 5 : i64, tpu.core_type = #tpu.core_type<tc>, window_params = [{transform_indices = @transform_0, window_bounds = array<i64: 1, 1, 64, 128>}, {transform_indices = @transform_1, window_bounds = array<i64: 1, 1, 128, 128>}, {transform_indices = @transform_2, window_bounds = array<i64: 1, 1, 128, 128>}, {pipeline_mode = #tpu.pipeline_mode<synchronous>, transform_indices = @transform_3, window_bounds = array<i64: 2, 128>}, {pipeline_mode = #tpu.pipeline_mode<synchronous>, transform_indices = @transform_4, window_bounds = array<i64: 2, 128>}, {pipeline_mode = #tpu.pipeline_mode<synchronous>, transform_indices = @transform_5, window_bounds = array<i64: 128, 128>}, {transform_indices = @transform_6, window_bounds = array<i64: 1, 64, 128>}]} {
    %c0_i32 = arith.constant 0 : i32
    %0 = arith.cmpi eq, %arg3, %c0_i32 : i32
    %1 = arith.extui %0 : i1 to i32
    %c0_i32_0 = arith.constant 0 : i32
    %2 = arith.cmpi ne, %1, %c0_i32_0 : i32
    scf.if %2 {
      %c0_18 = arith.constant 0 : index
      %c0_19 = arith.constant 0 : index
      %c0_20 = arith.constant 0 : index
      %c0_21 = arith.constant 0 : index
      %23 = vector.load %arg4[%c0_18, %c0_19, %c0_20, %c0_21] : memref<1x1x64x128xf32, #tpu.memory_space<vmem>>, vector<1x1x64x128xf32>
      %24 = vector.shape_cast %23 : vector<1x1x64x128xf32> to vector<64x128xf32>
      %c0_22 = arith.constant 0 : index
      %c0_23 = arith.constant 0 : index
      %25 = vector.load %arg7[%c0_22, %c0_23] : memref<2x128xf32, #tpu.memory_space<vmem>>, vector<1x128xf32>
      %c1 = arith.constant 1 : index
      %c0_24 = arith.constant 0 : index
      %26 = vector.load %arg7[%c1, %c0_24] : memref<2x128xf32, #tpu.memory_space<vmem>>, vector<1x128xf32>
      %cst_25 = arith.constant dense<0.000000e+00> : vector<64xf32>
      %27 = vector.multi_reduction <add>, %24, %cst_25 [1] : vector<64x128xf32> to vector<64xf32>
      %28 = vector.shape_cast %27 : vector<64xf32> to vector<64x1xf32>
      %cst_26 = arith.constant 1.280000e+02 : f32
      %29 = vector.broadcast %cst_26 : f32 to vector<64x1xf32>
      %30 = arith.divf %28, %29 : vector<64x1xf32>
      %31 = vector.broadcast %30 : vector<64x1xf32> to vector<64x128xf32>
      %32 = arith.subf %24, %31 : vector<64x128xf32>
      %33 = arith.mulf %32, %32 : vector<64x128xf32>
      %cst_27 = arith.constant dense<0.000000e+00> : vector<64xf32>
      %34 = vector.multi_reduction <add>, %33, %cst_27 [1] : vector<64x128xf32> to vector<64xf32>
      %35 = vector.shape_cast %34 : vector<64xf32> to vector<64x1xf32>
      %cst_28 = arith.constant 1.280000e+02 : f32
      %36 = vector.broadcast %cst_28 : f32 to vector<64x1xf32>
      %37 = arith.divf %35, %36 : vector<64x1xf32>
      %cst_29 = arith.constant 9.99999974E-6 : f32
      %38 = vector.broadcast %cst_29 : f32 to vector<64x1xf32>
      %39 = arith.addf %37, %38 : vector<64x1xf32>
      %40 = math.rsqrt %39 : vector<64x1xf32>
      %41 = vector.broadcast %40 : vector<64x1xf32> to vector<64x128xf32>
      %42 = arith.mulf %32, %41 : vector<64x128xf32>
      %43 = vector.broadcast %25 : vector<1x128xf32> to vector<64x128xf32>
      %44 = arith.mulf %42, %43 : vector<64x128xf32>
      %45 = vector.broadcast %26 : vector<1x128xf32> to vector<64x128xf32>
      %46 = arith.addf %44, %45 : vector<64x128xf32>
      %c0_30 = arith.constant 0 : index
      %c0_31 = arith.constant 0 : index
      %47 = vector.load %arg14[%c0_30, %c0_31] : memref<64x128xf32, #tpu.memory_space<vmem>>, vector<64x128xf32>
      tpu.vector_store %arg14[%c0_30, %c0_31], %46 {strides = array<i32>} : memref<64x128xf32, #tpu.memory_space<vmem>>, vector<64x128xf32>,
    } else {
    }
    %c0 = arith.constant 0 : index
    %c0_1 = arith.constant 0 : index
    %3 = vector.load %arg14[%c0, %c0_1] : memref<64x128xf32, #tpu.memory_space<vmem>>, vector<64x128xf32>
    %c0_2 = arith.constant 0 : index
    %c0_3 = arith.constant 0 : index
    %c0_4 = arith.constant 0 : index
    %c0_5 = arith.constant 0 : index
    %4 = vector.load %arg5[%c0_2, %c0_3, %c0_4, %c0_5] : memref<1x1x128x128xf32, #tpu.memory_space<vmem>>, vector<1x1x128x128xf32>
    %5 = vector.shape_cast %4 : vector<1x1x128x128xf32> to vector<128x128xf32>
    %cst = arith.constant dense<0.000000e+00> : vector<64x128xf32>
    %6 = tpu.matmul %3, %5, %cst {dimension_numbers = #tpu.dot_dimension_numbers<[1], [0], [0], [1], [0, 0, 1, 1], [], []>} : vector<64x128xf32>, vector<128x128xf32>, vector<64x128xf32> -> vector<64x128xf32>
    %c0_6 = arith.constant 0 : index
    %c0_7 = arith.constant 0 : index
    %c0_8 = arith.constant 0 : index
    %c0_9 = arith.constant 0 : index
    %7 = vector.load %arg6[%c0_6, %c0_7, %c0_8, %c0_9] : memref<1x1x128x128xf32, #tpu.memory_space<vmem>>, vector<1x1x128x128xf32>
    %8 = vector.shape_cast %7 : vector<1x1x128x128xf32> to vector<128x128xf32>
    %c0_i32_10 = arith.constant 0 : i32
    %9 = arith.cmpi eq, %arg3, %c0_i32_10 : i32
    %10 = arith.extui %9 : i1 to i32
    %c0_i32_11 = arith.constant 0 : i32
    %11 = arith.cmpi ne, %10, %c0_i32_11 : i32
    scf.if %11 {
      %cst_18 = arith.constant dense<0xFF800000> : vector<64xf32>
      %23 = vector.multi_reduction <maximumf>, %6, %cst_18 [1] : vector<64x128xf32> to vector<64xf32>
      %24 = vector.shape_cast %23 : vector<64xf32> to vector<64x1xf32>
      %25 = vector.broadcast %24 : vector<64x1xf32> to vector<64x128xf32>
      %26 = arith.subf %6, %25 : vector<64x128xf32>
      %27 = math.exp %26 : vector<64x128xf32>
      %c0_19 = arith.constant 0 : index
      %c0_20 = arith.constant 0 : index
      %28 = vector.load %arg11[%c0_19, %c0_20] : memref<64x1xf32, #tpu.memory_space<vmem>>, vector<64x1xf32>
      tpu.vector_store %arg11[%c0_19, %c0_20], %24 {strides = array<i32>} : memref<64x1xf32, #tpu.memory_space<vmem>>, vector<64x1xf32>,
      %cst_21 = arith.constant dense<0.000000e+00> : vector<64xf32>
      %29 = vector.multi_reduction <add>, %27, %cst_21 [1] : vector<64x128xf32> to vector<64xf32>
      %30 = vector.shape_cast %29 : vector<64xf32> to vector<64x1xf32>
      %c0_22 = arith.constant 0 : index
      %c0_23 = arith.constant 0 : index
      %31 = vector.load %arg12[%c0_22, %c0_23] : memref<64x1xf32, #tpu.memory_space<vmem>>, vector<64x1xf32>
      tpu.vector_store %arg12[%c0_22, %c0_23], %30 {strides = array<i32>} : memref<64x1xf32, #tpu.memory_space<vmem>>, vector<64x1xf32>,
      %cst_24 = arith.constant dense<0.000000e+00> : vector<64x128xf32>
      %32 = tpu.matmul %27, %8, %cst_24 {dimension_numbers = #tpu.dot_dimension_numbers<[1], [0], [0], [1], [0, 0, 1, 1], [], []>} : vector<64x128xf32>, vector<128x128xf32>, vector<64x128xf32> -> vector<64x128xf32>
      %33 = arith.index_cast %arg2 : i32 to index
      %c0_25 = arith.constant 0 : index
      %c0_26 = arith.constant 0 : index
      %34 = vector.load %arg13[%33, %c0_25, %c0_26] : memref<1x64x128xf32, #tpu.memory_space<vmem>>, vector<1x64x128xf32>
      %35 = vector.shape_cast %34 : vector<1x64x128xf32> to vector<64x128xf32>
      %36 = vector.shape_cast %32 : vector<64x128xf32> to vector<1x64x128xf32>
      tpu.vector_store %arg13[%33, %c0_25, %c0_26], %36 {strides = array<i32>} : memref<1x64x128xf32, #tpu.memory_space<vmem>>, vector<1x64x128xf32>,
    } else {
    }
    %c0_i32_12 = arith.constant 0 : i32
    %12 = arith.cmpi sgt, %arg3, %c0_i32_12 : i32
    %13 = arith.extui %12 : i1 to i32
    %c0_i32_13 = arith.constant 0 : i32
    %14 = arith.cmpi ne, %13, %c0_i32_13 : i32
    scf.if %14 {
      %c0_18 = arith.constant 0 : index
      %c0_19 = arith.constant 0 : index
      %23 = vector.load %arg11[%c0_18, %c0_19] : memref<64x1xf32, #tpu.memory_space<vmem>>, vector<64x1xf32>
      %cst_20 = arith.constant dense<0xFF800000> : vector<64xf32>
      %24 = vector.multi_reduction <maximumf>, %6, %cst_20 [1] : vector<64x128xf32> to vector<64xf32>
      %25 = vector.shape_cast %24 : vector<64xf32> to vector<64x1xf32>
      %26 = arith.maximumf %23, %25 : vector<64x1xf32>
      %27 = arith.subf %23, %26 : vector<64x1xf32>
      %28 = math.exp %27 : vector<64x1xf32>
      %29 = vector.broadcast %26 : vector<64x1xf32> to vector<64x128xf32>
      %30 = arith.subf %6, %29 : vector<64x128xf32>
      %31 = math.exp %30 : vector<64x128xf32>
      %c0_21 = arith.constant 0 : index
      %c0_22 = arith.constant 0 : index
      %32 = vector.load %arg11[%c0_21, %c0_22] : memref<64x1xf32, #tpu.memory_space<vmem>>, vector<64x1xf32>
      tpu.vector_store %arg11[%c0_21, %c0_22], %26 {strides = array<i32>} : memref<64x1xf32, #tpu.memory_space<vmem>>, vector<64x1xf32>,
      %c0_23 = arith.constant 0 : index
      %c0_24 = arith.constant 0 : index
      %33 = vector.load %arg12[%c0_23, %c0_24] : memref<64x1xf32, #tpu.memory_space<vmem>>, vector<64x1xf32>
      %34 = arith.mulf %28, %33 : vector<64x1xf32>
      %cst_25 = arith.constant dense<0.000000e+00> : vector<64xf32>
      %35 = vector.multi_reduction <add>, %31, %cst_25 [1] : vector<64x128xf32> to vector<64xf32>
      %36 = vector.shape_cast %35 : vector<64xf32> to vector<64x1xf32>
      %37 = arith.addf %34, %36 : vector<64x1xf32>
      %c0_26 = arith.constant 0 : index
      %c0_27 = arith.constant 0 : index
      %38 = vector.load %arg12[%c0_26, %c0_27] : memref<64x1xf32, #tpu.memory_space<vmem>>, vector<64x1xf32>
      tpu.vector_store %arg12[%c0_26, %c0_27], %37 {strides = array<i32>} : memref<64x1xf32, #tpu.memory_space<vmem>>, vector<64x1xf32>,
      %39 = arith.index_cast %arg2 : i32 to index
      %c0_28 = arith.constant 0 : index
      %c0_29 = arith.constant 0 : index
      %40 = vector.load %arg13[%39, %c0_28, %c0_29] : memref<1x64x128xf32, #tpu.memory_space<vmem>>, vector<1x64x128xf32>
      %41 = vector.shape_cast %40 : vector<1x64x128xf32> to vector<64x128xf32>
      %42 = vector.broadcast %28 : vector<64x1xf32> to vector<64x128xf32>
      %43 = arith.mulf %41, %42 : vector<64x128xf32>
      %cst_30 = arith.constant dense<0.000000e+00> : vector<64x128xf32>
      %44 = tpu.matmul %31, %8, %cst_30 {dimension_numbers = #tpu.dot_dimension_numbers<[1], [0], [0], [1], [0, 0, 1, 1], [], []>} : vector<64x128xf32>, vector<128x128xf32>, vector<64x128xf32> -> vector<64x128xf32>
      %45 = arith.addf %43, %44 : vector<64x128xf32>
      %46 = arith.index_cast %arg2 : i32 to index
      %c0_31 = arith.constant 0 : index
      %c0_32 = arith.constant 0 : index
      %47 = vector.load %arg13[%46, %c0_31, %c0_32] : memref<1x64x128xf32, #tpu.memory_space<vmem>>, vector<1x64x128xf32>
      %48 = vector.shape_cast %47 : vector<1x64x128xf32> to vector<64x128xf32>
      %49 = vector.shape_cast %45 : vector<64x128xf32> to vector<1x64x128xf32>
      tpu.vector_store %arg13[%46, %c0_31, %c0_32], %49 {strides = array<i32>} : memref<1x64x128xf32, #tpu.memory_space<vmem>>, vector<1x64x128xf32>,
    } else {
    }
    %c1_i32 = arith.constant 1 : i32
    %15 = arith.cmpi eq, %arg3, %c1_i32 : i32
    %16 = arith.extui %15 : i1 to i32
    %c0_i32_14 = arith.constant 0 : i32
    %17 = arith.cmpi ne, %16, %c0_i32_14 : i32
    scf.if %17 {
      %23 = arith.index_cast %arg2 : i32 to index
      %c0_18 = arith.constant 0 : index
      %c0_19 = arith.constant 0 : index
      %24 = vector.load %arg13[%23, %c0_18, %c0_19] : memref<1x64x128xf32, #tpu.memory_space<vmem>>, vector<1x64x128xf32>
      %25 = vector.shape_cast %24 : vector<1x64x128xf32> to vector<64x128xf32>
      %c0_20 = arith.constant 0 : index
      %c0_21 = arith.constant 0 : index
      %26 = vector.load %arg12[%c0_20, %c0_21] : memref<64x1xf32, #tpu.memory_space<vmem>>, vector<64x1xf32>
      %27 = tpu.reciprocal %26 {approx = true} : vector<64x1xf32> -> vector<64x1xf32>
      %28 = vector.broadcast %27 : vector<64x1xf32> to vector<64x128xf32>
      %29 = arith.mulf %25, %28 : vector<64x128xf32>
      %30 = arith.index_cast %arg2 : i32 to index
      %c0_22 = arith.constant 0 : index
      %c0_23 = arith.constant 0 : index
      %31 = vector.load %arg13[%30, %c0_22, %c0_23] : memref<1x64x128xf32, #tpu.memory_space<vmem>>, vector<1x64x128xf32>
      %32 = vector.shape_cast %31 : vector<1x64x128xf32> to vector<64x128xf32>
      %33 = vector.shape_cast %29 : vector<64x128xf32> to vector<1x64x128xf32>
      tpu.vector_store %arg13[%30, %c0_22, %c0_23], %33 {strides = array<i32>} : memref<1x64x128xf32, #tpu.memory_space<vmem>>, vector<1x64x128xf32>,
    } else {
    }
    %c1_i32_15 = arith.constant 1 : i32
    %18 = arith.cmpi eq, %arg3, %c1_i32_15 : i32
    %c0_i32_16 = arith.constant 0 : i32
    %19 = arith.cmpi eq, %arg2, %c0_i32_16 : i32
    %20 = arith.andi %18, %19 : i1
    %21 = arith.extui %20 : i1 to i32
    %c0_i32_17 = arith.constant 0 : i32
    %22 = arith.cmpi ne, %21, %c0_i32_17 : i32
    scf.if %22 {
      %c0_18 = arith.constant 0 : index
      %c0_19 = arith.constant 0 : index
      %c0_20 = arith.constant 0 : index
      %23 = vector.load %arg13[%c0_18, %c0_19, %c0_20] : memref<1x64x128xf32, #tpu.memory_space<vmem>>, vector<1x64x128xf32>
      %24 = vector.shape_cast %23 : vector<1x64x128xf32> to vector<64x128xf32>
      %cst_21 = arith.constant dense<0.000000e+00> : vector<64xf32>
      %25 = vector.multi_reduction <add>, %24, %cst_21 [1] : vector<64x128xf32> to vector<64xf32>
      %26 = vector.shape_cast %25 : vector<64xf32> to vector<64x1xf32>
      %cst_22 = arith.constant 7.812500e-03 : f32
      %27 = vector.broadcast %cst_22 : f32 to vector<64x1xf32>
      %28 = arith.mulf %26, %27 : vector<64x1xf32>
      %c0_23 = arith.constant 0 : index
      %c0_24 = arith.constant 0 : index
      %c0_25 = arith.constant 0 : index
      %29 = vector.load %arg13[%c0_23, %c0_24, %c0_25] : memref<1x64x128xf32, #tpu.memory_space<vmem>>, vector<1x64x128xf32>
      %30 = vector.shape_cast %29 : vector<1x64x128xf32> to vector<64x128xf32>
      %31 = vector.broadcast %28 : vector<64x1xf32> to vector<64x128xf32>
      %32 = arith.subf %30, %31 : vector<64x128xf32>
      %33 = arith.mulf %32, %32 : vector<64x128xf32>
      %cst_26 = arith.constant dense<0.000000e+00> : vector<64xf32>
      %34 = vector.multi_reduction <add>, %33, %cst_26 [1] : vector<64x128xf32> to vector<64xf32>
      %35 = vector.shape_cast %34 : vector<64xf32> to vector<64x1xf32>
      %cst_27 = arith.constant 7.812500e-03 : f32
      %36 = vector.broadcast %cst_27 : f32 to vector<64x1xf32>
      %37 = arith.mulf %35, %36 : vector<64x1xf32>
      %cst_28 = arith.constant 9.99999974E-6 : f32
      %38 = vector.broadcast %cst_28 : f32 to vector<64x1xf32>
      %39 = arith.addf %37, %38 : vector<64x1xf32>
      %40 = math.rsqrt %39 : vector<64x1xf32>
      %c0_29 = arith.constant 0 : index
      %c0_30 = arith.constant 0 : index
      %41 = vector.load %arg8[%c0_29, %c0_30] : memref<2x128xf32, #tpu.memory_space<vmem>>, vector<1x128xf32>
      %c1 = arith.constant 1 : index
      %c0_31 = arith.constant 0 : index
      %42 = vector.load %arg8[%c1, %c0_31] : memref<2x128xf32, #tpu.memory_space<vmem>>, vector<1x128xf32>
      %c0_32 = arith.constant 0 : index
      %c0_33 = arith.constant 0 : index
      %c0_34 = arith.constant 0 : index
      %43 = vector.load %arg13[%c0_32, %c0_33, %c0_34] : memref<1x64x128xf32, #tpu.memory_space<vmem>>, vector<1x64x128xf32>
      %44 = vector.shape_cast %43 : vector<1x64x128xf32> to vector<64x128xf32>
      %45 = vector.broadcast %28 : vector<64x1xf32> to vector<64x128xf32>
      %46 = arith.subf %44, %45 : vector<64x128xf32>
      %47 = vector.broadcast %40 : vector<64x1xf32> to vector<64x128xf32>
      %48 = arith.mulf %46, %47 : vector<64x128xf32>
      %49 = vector.broadcast %41 : vector<1x128xf32> to vector<64x128xf32>
      %50 = arith.mulf %48, %49 : vector<64x128xf32>
      %51 = vector.broadcast %42 : vector<1x128xf32> to vector<64x128xf32>
      %52 = arith.addf %50, %51 : vector<64x128xf32>
      %c0_35 = arith.constant 0 : index
      %c0_36 = arith.constant 0 : index
      %53 = vector.load %arg15[%c0_35, %c0_36] : memref<64x128xf32, #tpu.memory_space<vmem>>, vector<64x128xf32>
      tpu.vector_store %arg15[%c0_35, %c0_36], %52 {strides = array<i32>} : memref<64x128xf32, #tpu.memory_space<vmem>>, vector<64x128xf32>,
      %c0_37 = arith.constant 0 : index
      %c0_38 = arith.constant 0 : index
      %54 = vector.load %arg15[%c0_37, %c0_38] : memref<64x128xf32, #tpu.memory_space<vmem>>, vector<64x128xf32>
      %c0_39 = arith.constant 0 : index
      %c0_40 = arith.constant 0 : index
      %55 = vector.load %arg9[%c0_39, %c0_40] : memref<128x128xf32, #tpu.memory_space<vmem>>, vector<128x128xf32>
      %cst_41 = arith.constant dense<0.000000e+00> : vector<64x128xf32>
      %56 = tpu.matmul %54, %55, %cst_41 {dimension_numbers = #tpu.dot_dimension_numbers<[1], [0], [0], [1], [0, 0, 1, 1], [], []>} : vector<64x128xf32>, vector<128x128xf32>, vector<64x128xf32> -> vector<64x128xf32>
      %c0_42 = arith.constant 0 : index
      %c0_43 = arith.constant 0 : index
      %c0_44 = arith.constant 0 : index
      %57 = vector.load %arg10[%c0_42, %c0_43, %c0_44] : memref<1x64x128xf32, #tpu.memory_space<vmem>>, vector<1x64x128xf32>
      %58 = vector.shape_cast %57 : vector<1x64x128xf32> to vector<64x128xf32>
      %59 = vector.shape_cast %56 : vector<64x128xf32> to vector<1x64x128xf32>
      tpu.vector_store %arg10[%c0_42, %c0_43, %c0_44], %59 {strides = array<i32>} : memref<1x64x128xf32, #tpu.memory_space<vmem>>, vector<1x64x128xf32>,
    } else {
    }
    return
  }
  func.func @transform_0(%arg0: i32, %arg1: i32, %arg2: i32, %arg3: i32) -> (i32, i32, i32, i32) {
    %c0_i32 = arith.constant 0 : i32
    %c0_i32_0 = arith.constant 0 : i32
    return %arg0, %arg2, %arg1, %c0_i32 : i32, i32, i32, i32
  }
  func.func @transform_1(%arg0: i32, %arg1: i32, %arg2: i32, %arg3: i32) -> (i32, i32, i32, i32) {
    %c0_i32 = arith.constant 0 : i32
    %c0_i32_0 = arith.constant 0 : i32
    return %arg0, %arg2, %c0_i32, %arg3 : i32, i32, i32, i32
  }
  func.func @transform_2(%arg0: i32, %arg1: i32, %arg2: i32, %arg3: i32) -> (i32, i32, i32, i32) {
    %c0_i32 = arith.constant 0 : i32
    %c0_i32_0 = arith.constant 0 : i32
    return %arg0, %arg2, %arg3, %c0_i32 : i32, i32, i32, i32
  }
  func.func @transform_3(%arg0: i32, %arg1: i32, %arg2: i32, %arg3: i32) -> (i32, i32) {
    %c0_i32 = arith.constant 0 : i32
    %c0_i32_0 = arith.constant 0 : i32
    %c0_i32_1 = arith.constant 0 : i32
    return %c0_i32, %c0_i32_0 : i32, i32
  }
  func.func @transform_4(%arg0: i32, %arg1: i32, %arg2: i32, %arg3: i32) -> (i32, i32) {
    %c0_i32 = arith.constant 0 : i32
    %c0_i32_0 = arith.constant 0 : i32
    %c0_i32_1 = arith.constant 0 : i32
    return %c0_i32, %c0_i32_0 : i32, i32
  }
  func.func @transform_5(%arg0: i32, %arg1: i32, %arg2: i32, %arg3: i32) -> (i32, i32) {
    %c0_i32 = arith.constant 0 : i32
    %c0_i32_0 = arith.constant 0 : i32
    %c0_i32_1 = arith.constant 0 : i32
    return %c0_i32, %c0_i32_0 : i32, i32
  }
  func.func @transform_6(%arg0: i32, %arg1: i32, %arg2: i32, %arg3: i32) -> (i32, i32, i32) {
    %c0_i32 = arith.constant 0 : i32
    %c0_i32_0 = arith.constant 0 : i32
    return %arg0, %arg1, %c0_i32 : i32, i32, i32
  }
}

</mosaic_0001>

<bundles_post_ra>
// kernel: tpu_custom_call.1
= control target key start
LH: loop header
LB: loop body
LE: loop exit
PB: predicated region body
PF: predicated region fallthrough
CT: control target
= control target key end

     0   :  { %s3576_s0 = inlined_call_operand.hbm [shape: f32[2,1,128,128], index: 0, kind: input, shape index: {}]   ;;  %s3577_s1 = inlined_call_operand.hbm [shape: f32[2,1,128,256], index: 1, kind: input, shape index: {}]   ;;  %s3578_s2 = inlined_call_operand.hbm [shape: f32[2,1,256,128], index: 2, kind: input, shape index: {}]   ;;  %s3579_s3 = inlined_call_operand.vmem [shape: f32[2,128], index: 3, kind: input, shape index: {}]   ;;  %s3580_s4 = inlined_call_operand.vmem [shape: f32[2,128], index: 4, kind: input, shape index: {}]   ;;  %s3581_s5 = inlined_call_operand.hbm [shape: f32[128,128], index: 5, kind: input, shape index: {}]   ;;  %s3582_s6 = inlined_call_operand.hbm [shape: f32[2,128,128], index: 6, kind: output, shape index: {}]  }
   0x1   :  { %3615 = sst [smem:[#allocation35_spill]] %s3577_s1 }
   0x2   :  { %3616 = sst [smem:[#allocation36_spill]] %s3578_s2 }
   0x3   :  { %3617 = sst [smem:[#allocation37_spill]] %s3579_s3 }
   0x4   :  { %3618 = sst [smem:[#allocation38_spill]] %s3580_s4 }
   0x5   :  { %3619 = sst [smem:[#allocation39_spill]] %s3581_s5 }
   0x6   :  { %3620 = sst [smem:[#allocation40_spill]] %s3582_s6 }
   0x7   :  { %11 = vsyncpa [#allocation8], 0 }
   0x8   :  { %13 = vsyncpa [#allocation8 + $0x1], 0 }
   0x9   :  { %14 = vsyncpa [#allocation11], 0 }
   0xa   :  { %16 = vsyncpa [#allocation11 + $0x1], 0 }
   0xb   :  { %17 = vsyncpa [#allocation14], 0 }
   0xc   :  { %18 = vsyncpa [#allocation9], 0 }
   0xd   :  { %20 = vsyncpa [#allocation9 + $0x1], 0  ;;  %s2777_s21 = smov 0   ;;  %s2779_s22 = smov 0  }
   0xe   :  { %s2781_s23 = smov 0   ;;  %s2783_s24 = smov 0  }
   0xf   :  { %s2785_s25 = smov 0   ;;  %s2787_s26 = smov 0  }
  0x10   :  { %s2789_s27 = smov 0   ;;  %s2791_s28 = smov 0  }
  0x11   :  { %s2793_s29 = smov 0   ;;  %s2795_s30 = smov 0  }
  0x12   :  { %s2797_s7 = smov 0   ;;  %s2799_s8 = smov 0  }
  0x13   :  { %s2801_s9 = smov 0  }
  0x14 LB: > { %3621 = sst [smem:[#allocation20_spill]] %s2684_s22  ;;  %s41_s10 = sadd.s32 1, %s2716_s30  ;;  %s2728_s9 = sphi %s2801_s9, %s26_s9   ;;  %s2724_s8 = sphi %s2799_s8, %s3700_s8   ;;  %s2720_s7 = sphi %s2797_s7, %s3690_s7   ;;  %s2716_s30 = sphi %s2795_s30, %s3699_s30   ;;  %s2712_s29 = sphi %s2793_s29, %s3698_s29   ;;  %s2708_s28 = sphi %s2791_s28, %s3697_s28   ;;  %s2704_s27 = sphi %s2789_s27, %s3696_s27   ;;  %s2700_s26 = sphi %s2787_s26, %s3695_s26   ;;  %s2696_s25 = sphi %s2785_s25, %s3694_s25   ;;  %s2692_s24 = sphi %s2783_s24, %s3688_s24   ;;  %s2688_s23 = sphi %s2781_s23, %s3693_s23   ;;  %s2684_s22 = sphi %s2779_s22, %s3692_s22   ;;  %s2680_s21 = sphi %s2777_s21, %s3691_s21  }
  0x15   : > { %3622 = sst [smem:[#allocation21_spill]] %s2692_s24  ;;  %p2844_p0 = scmp.ge.s32.totalorder %s41_s10, 2 }
  0x16   : > { %3623 = sst [smem:[#allocation22_spill]] %s2696_s25  ;;  %p3592_p1 = scmp.eq.s32.totalorder %s2728_s9, 0 }
  0x17   : > { %3624 = sst [smem:[#allocation23_spill]] %s2704_s27  ;;  %p100_p2 = scmp.ne.s32.totalorder %s2688_s23, %s2684_s22 }
  0x18   : > { %3625 = sst [smem:[#allocation24_spill]] %s2708_s28  ;;  %s3702_s10 = smov (%p2844_p0, %s41_s10), 0 }
  0x19   : > { %3626 = sst [smem:[#allocation25_spill]] %s2712_s29  ;;  %p2858_p3 = por %p100_p2, %p3592_p1 }
  0x1a   : > { %3627 = sst [smem:[#allocation26_spill]] %s2720_s7  ;;  %p3587_p4 = scmp.lt.s32.totalorder %s2728_s9, 8 }
  0x1b   : > { %s295_s16 = sand.u32 1, %s2728_s9   ;;  %s297_s17 = sand.u32 1, %s2688_s23  }
  0x1c   : > { %s2867_s18 = sshll.u32 %s297_s17, 7  ;;  %s3585_s19 = sshll.u32 %s2724_s8, 5 }
  0x1d   : > { %s306_s20 = sadd.s32 %s2716_s30, %s3585_s19  ;;  %s299_s13 = scalar_lea.vmem [#allocation10], %s2867_s18 }
  0x1e   : > { %s309_s11 = sshll.u32 %s299_s13, 4  ;;  %s1801_s6 = sshll.u32 %s306_s20, 7  ;;  %s310_s11 = int_to_ptr.vmem [resolvable:$true] %s309_s11 }
  0x1f   : > { %s3630_s1 = sld [smem:[#allocation35_spill]]  ;;  %p2881_p5 = pnand %p3587_p4, %p2858_p3 }
  0x20   : > { %s2885_s17 = scalar_lea.sflag [#allocation11], %s295_s16  ;;  %s2487_s19 = scalar_lea.vmem %s310_s11, 2048 }
  0x21   : > { %3632 = sst [smem:[#allocation27_spill]] %s2885_s17  ;;  %p3586_p6 = pneg %p2881_p5 }
  0x22   : > { %p2488_p7 = scmp.ne.s32.totalorder %s310_s11, %s2487_s19  ;;  %s2730_s28 = smov [#allocation10]  }
  0x24   : > { %p2490_p8 = pnand %p2488_p7, %p3586_p6 }
  0x25   : > { %s308_s4 = scalar_lea.hbm %s3630_s1, %s1801_s6  ;;  %s2492_s6 = sshll.u32 %s2730_s28, 4  ;;  %s2493_s6 = int_to_ptr.vmem [resolvable:$false] %s2492_s6 }
  0x26   : > { %p2491_p9 = pneg %p2490_p8  ;;  %s2494_s29 = scalar_lea.vmem %s2493_s6, 4096 }
  0x27   : > { %p2495_p10 = scmp.lt.s32.totalorder %s310_s11, %s2493_s6  ;;  %p2496_p11 = scmp.lt.s32.totalorder %s2494_s29, %s2487_s19 }
  0x29   : > { %p2497_p12 = por %p2496_p11, %p2495_p10 }
  0x2b   : > { %p2498_p13 = pnand %p2497_p12, %p2491_p9 }
  0x2d   : > { %2501 = shalt.err (!%p2498_p13)
}
  0x2e   : > { %s2731_s13 = smov 256   ;;  %s3588_s14 = smov 128  }
  0x2f   : > { %s3590_s16 = smov 8   ;;  %s2898_s19 = sadd.s32 4294967295, %s2728_s9  }
  0x30   : > { %2250 = dma.hbm_to_vmem [thread:$0]  (!%p2881_p5), %s308_s4, 2048, %s310_s11, %s2885_s17, %s2731_s13, %s3588_s14, %s3590_s16  }
  0x31   : > { %3633 = sst [smem:[#allocation28_spill]] %s2898_s19  ;;  %s1791_s20 = sadd.s32 4294967294, %s2728_s9  }
  0x32   : > { %p76_p2 = scmp.ne.s32.totalorder %s2696_s25, %s2692_s24  ;;  %p77_p3 = scmp.eq.s32.totalorder %s2898_s19, 0 }
  0x33   : > { %p106_p7 = scmp.ne.s32.totalorder %s2684_s22, %s2680_s21  ;;  %p231_p10 = scmp.eq.s32.totalorder %s1791_s20, 7 }
  0x34   : > { %p2909_p9 = por %p77_p3, %p76_p2  ;;  %p1792_p12 = scmp.ge.s32.totalorder %s2728_s9, 1 }
  0x35   : > { %p2915_p11 = por %p106_p7, %p77_p3  ;;  %p2920_p13 = por %p231_p10, %p76_p2 }
  0x36   : > { %s3634_s28 = scalar_select %p2909_p9, 1, 0 }
  0x37   : > { %s3636_s4 = scalar_select %p2915_p11, 1, 0 }
  0x38   : > { %3635 = sst [smem:[#allocation29_spill]] %s3634_s28  ;;  %p238_p6 = scmp.lt.s32.totalorder %s2728_s9, 9 }
  0x39   : > { %3637 = sst [smem:[#allocation30_spill]] %s3636_s4  ;;  %s2734_s6 = smov [#allocation13]  }
  0x3a   : > { %s3638_s11 = scalar_select %p2920_p13, 1, 0 }
  0x3b   : > { %p2925_p4 = pnand %p1792_p12, %p238_p6  ;;  %s256_s29 = sshll.u32 %s2734_s6, 4  ;;  %s257_s29 = int_to_ptr.vmem [resolvable:$true] %s256_s29 }
  0x3c   : > { %3639 = sst [smem:[#allocation31_spill]] %s3638_s11  ;;  %s48_s20 = sadd.s32 1, %s2720_s7 }
  0x3d   : > { %s3640_s21 = scalar_select %p2925_p4, 1, 0 }
  0x3e   : > { %p2240_p8 = pneg %p2925_p4  ;;  %s3704_s20 = smov (!%p2844_p0, %s48_s20), %s2720_s7 }
  0x3f   : > { %3641 = sst [smem:[#allocation32_spill]] %s3640_s21  ;;  %s2513_s16 = scalar_lea.vmem %s257_s29, 2048 }
  0x40   : > { %p2933_p7 = pnand %p2240_p8, %p77_p3  ;;  %p2514_p2 = scmp.ne.s32.totalorder %s257_s29, %s2513_s16 }
  0x41   : > { %p2521_p1 = scmp.lt.s32.totalorder %s257_s29, %s257_s29  ;;  %p2522_p13 = scmp.lt.s32.totalorder %s2513_s16, %s2513_s16 }
  0x42   : > { %p2504_p6 = pneg %p2933_p7 }
  0x43   : > { %p2523_p11 = por %p2522_p13, %p2521_p1 }
  0x44   : > { %p2516_p10 = pnand %p2514_p2, %p2504_p6 }
  0x46   : > { %p2517_p12 = pneg %p2516_p10 }
  0x48   : > { %p2524_p9 = pnand %p2523_p11, %p2517_p12 }
  0x4a   : > { %2527 = shalt.err (!%p2524_p9)
}
  0x4b   : > { %s3643_s6 = smov 8   ;;  %s3644_s1 = smov 128  }
  0x4c   : > { %s3645_s5 = sld [smem:[#allocation39_spill]]  ;;  %p50_p0 = scmp.ge.s32.totalorder %s3704_s20, 2 }
  0x4d   : > { %p70_p1 = scmp.ne.s32.totalorder %s2700_s26, %s2696_s25  ;;  %s3607_s16 = sand.u32 1, %s2700_s26  }
  0x4e   : > { %s1796_s13 = sshll.u32 %s2720_s7, 3  ;;  %s3706_s20 = smov (%p50_p0, %s3704_s20), 0 }
  0x4f   : > { %3646 = sst [smem:[#allocation33_spill]] %s3706_s20  ;;  %s3647_s11 = sadd.s32 1, %s2724_s8 }
  0x50   : > { %s3708_s11 = smov (!%p50_p0, %s3647_s11), %s2724_s8  ;;  %s59_s12 = ssub.s32 %s2720_s7, %s3706_s20 }
  0x51   : > { %p3648_p8 = scmp.eq.s32.totalorder %s2728_s9, 0  ;;  %p54_p11 = scmp.ge.s32.totalorder %s3708_s11, 2 }
  0x52   : > { %2243 = dma.hbm_to_vmem [thread:$0]  (!%p2933_p7), %s3645_s5, 2048, %s257_s29, [#allocation14], %s3644_s1, %s3644_s1, %s3643_s6  }
  0x53   : > { %p2965_p9 = por %p3648_p8, %p70_p1  ;;  %p3650_p13 = scmp.eq.s32.totalorder %s2898_s19, 7 }
  0x54   : > { %s1795_s5 = sshll.u32 %s3607_s16, 6  ;;  %s3710_s11 = smov (%p54_p11, %s3708_s11), 0 }
  0x55   : > { %p2971_p7 = por %p3650_p13, %p70_p1  ;;  %s1797_s20 = sshll.u32 %s2724_s8, 4 }
  0x56   : > { %s56_s7 = ssub.s32 %s2724_s8, %s3710_s11  ;;  %s282_s24 = sadd.s32 %s1797_s20, %s1796_s13 }
  0x57   : > { %s3651_s29 = scalar_select %p2971_p7, 1, 0 }
  0x58   : > { %s60_s3 = sor.u32 %s59_s12, %s56_s7  ;;  %s3653_s27 = ssub.s32 %s2716_s30, %s3702_s10 }
  0x59   : > { %3652 = sst [smem:[#allocation34_spill]] %s3651_s29  ;;  %s90_s4 = sor.u32 %s3653_s27, %s56_s7 }
  0x5a   : > { %p61_p6 = scmp.eq.s32.totalorder %s60_s3, 0  ;;  %p91_p2 = scmp.eq.s32.totalorder %s90_s4, 0 }
  0x5b   : > { %s1798_s29 = sshll.u32 %s282_s24, 7  ;;  %s274_s22 = scalar_lea.vmem [#allocation7], %s1795_s5 }
  0x5c   : > { %s285_s16 = sshll.u32 %s274_s22, 4  ;;  %s3654_s19 = sadd.s32 1, %s2700_s26  ;;  %s286_s16 = int_to_ptr.vmem [resolvable:$true] %s285_s16 }
  0x5d   : > { %s2988_s28 = scalar_select %p61_p6, %s2700_s26, %s3654_s19  }
  0x5e   : > { %s3655_s25 = sadd.s32 1, %s2688_s23  ;;  %s284_s20 = scalar_lea.hbm %s3576_s0, %s1798_s29 }
  0x5f   : > { %s2993_s21 = scalar_select %p91_p2, %s2688_s23, %s3655_s25  }
  0x60   : > { %p3656_p10 = scmp.lt.s32.totalorder %s2728_s9, 8  ;;  %s1803_s3 = sshll.u32 %s2716_s30, 4 }
  0x61   : > { %s323_s5 = scalar_lea.vmem [#allocation12], %s2867_s18  ;;  %s3658_s24 = sshll.u32 %s2724_s8, 5 }
  0x62   : > { %p3002_p12 = pnand %p3656_p10, %p2965_p9  ;;  %s334_s22 = sshll.u32 %s323_s5, 4  ;;  %s335_s22 = int_to_ptr.vmem [resolvable:$true] %s334_s22 }
  0x63   : > { %s331_s7 = sadd.s32 %s1803_s3, %s3658_s24  ;;  %s3659_s19 = sand.u32 1, %s2700_s26  }
  0x64   : > { %s271_s25 = scalar_lea.sflag [#allocation8], %s3659_s19  ;;  %p2530_p0 = pneg %p3002_p12 }
  0x65   : > { %s2541_s4 = scalar_lea.vmem %s286_s16, 1024  ;;  %s2735_s2 = smov [#allocation7]  }
  0x66   : > { %p2542_p1 = scmp.ne.s32.totalorder %s286_s16, %s2541_s4  ;;  %s2546_s17 = sshll.u32 %s2735_s2, 4  ;;  %s2547_s17 = int_to_ptr.vmem [resolvable:$false] %s2546_s17 }
  0x67   : > { %s2548_s14 = scalar_lea.vmem %s2547_s17, 2048  ;;  %p2549_p9 = scmp.lt.s32.totalorder %s286_s16, %s2547_s17 }
  0x68   : > { %p2544_p8 = pnand %p2542_p1, %p2530_p0  ;;  %p2550_p13 = scmp.lt.s32.totalorder %s2548_s14, %s2541_s4 }
  0x6a   : > { %p2545_p11 = pneg %p2544_p8  ;;  %p2551_p6 = por %p2550_p13, %p2549_p9 }
  0x6c   : > { %p2552_p2 = pnand %p2551_p6, %p2545_p11 }
  0x6e   : > { %2555 = shalt.err (!%p2552_p2)
}
  0x6f   : > { %2247 = dma.hbm_to_vmem [thread:$0]  (!%p3002_p12), %s284_s20, 1024, %s286_s16, %s271_s25, %s3644_s1, %s3644_s1, %s3643_s6  }
  0x70   : > { %s1805_s18 = sshll.u32 %s331_s7, 7  ;;  %s3660_s29 = sld [smem:[#allocation36_spill]] }
  0x71   : > { %s2569_s5 = scalar_lea.vmem %s335_s22, 2048  ;;  %p3661_p0 = pneg %p2881_p5 }
  0x72   : > { %p2570_p10 = scmp.ne.s32.totalorder %s335_s22, %s2569_s5  ;;  %s2736_s24 = smov [#allocation12]  }
  0x73   : > { %s2574_s19 = sshll.u32 %s2736_s24, 4  ;;  %s2575_s19 = int_to_ptr.vmem [resolvable:$false] %s2574_s19 }
  0x74   : > { %p2572_p1 = pnand %p2570_p10, %p3661_p0  ;;  %s2576_s27 = scalar_lea.vmem %s2575_s19, 4096 }
  0x75   : > { %p2577_p11 = scmp.lt.s32.totalorder %s335_s22, %s2575_s19  ;;  %p2578_p9 = scmp.lt.s32.totalorder %s2576_s27, %s2569_s5 }
  0x76   : > { %s333_s3 = scalar_lea.hbm %s3660_s29, %s1805_s18  ;;  %p2573_p8 = pneg %p2572_p1 }
  0x77   : > { %p2579_p13 = por %p2578_p9, %p2577_p11 }
  0x79   : > { %p2580_p12 = pnand %p2579_p13, %p2573_p8 }
  0x7b   : > { %2583 = shalt.err (!%p2580_p12)
}
  0x7c   : > { %s3662_s16 = sld [smem:[#allocation27_spill]] }
  0x7d   : > { %s3664_s7 = sld [smem:[#allocation22_spill]] (!%p2925_p4) }
  0x7e   : > { %346 = sbr.rel (%p2925_p4) target bundleno = 2320 (0x910), region = 44  ;;  %s3665_s25 = sld [smem:[#allocation29_spill]] (!%p2925_p4) }
  0x82   : > { %2253 = dma.hbm_to_vmem [thread:$0]  (!%p2881_p5), %s333_s3, 2048, %s335_s22, %s3662_s16, %s3644_s1, %s3644_s1, %s3643_s6  }
  0x83   : > { %s3034_s4 = sand.u32 1, %s3664_s7  }
  0x84   : > { %s1807_s2 = sshll.u32 %s3034_s4, 6  ;;  %s349_s17 = scalar_lea.sflag [#allocation8], %s3034_s4 }
  0x85   : > { %s352_s14 = scalar_lea.vmem [#allocation7], %s1807_s2  ;;  %p3666_p6 = scmp.ne.s32.totalorder %s3665_s25, 0 }
  0x87   : > { %2663 = dma.done.wait (%p3666_p6), %s349_s17, 1024  }
  0x88   : > { %2665 = vsyncadd (%p3666_p6), %s349_s17, 4294966272  ;;  %s3667_s15 = sld [smem:[#allocation28_spill]] }
  0x89   : > { %s3668_s18 = sld [smem:[#allocation20_spill]] }
  0x8a   : > { %s3669_s1 = sld [smem:[#allocation30_spill]] }
  0x8e   : > { %s357_s6 = sand.u32 1, %s3667_s15  }
  0x8f   : > { %s359_s22 = sand.u32 1, %s3668_s18   ;;  %s358_s12 = scalar_lea.sflag [#allocation11], %s357_s6 }
  0x90   : > { %s1808_s13 = sshll.u32 %s359_s22, 7  ;;  %p3670_p4 = scmp.ne.s32.totalorder %s3669_s1, 0 }
  0x91   : > { %s3044_s29 = scalar_lea.vmem [#allocation10], %s1808_s13 }
  0x92   : > { %2667 = dma.done.wait (%p3670_p4), %s358_s12, 4096  }
  0x93   : > { %2669 = vsyncadd (%p3670_p4), %s358_s12, 4294963200  ;;  %s3050_s3 = scalar_lea.vmem [#allocation12], %s1808_s13 }
  0x94   : > { %2671 = dma.done.wait (%p77_p3), [#allocation14], 2048  }
  0x95   : > { %2673 = vsyncadd (%p77_p3), [#allocation14], 4294965248  ;;  %s3056_s5 = scalar_lea.vmem [#allocation15], %s1807_s2  ;;  %s3671_s24 = sld [smem:[#allocation23_spill]] }
  0x9b   : > { %p1812_p5 = scmp.ne.s32.totalorder %s3671_s24, 0 }
  0x9c   : > { %s3672_s16 = sld [smem:[#allocation37_spill]] (!%p1812_p5) }
  0x9d   : > { %419 = sbr.rel (%p1812_p5) target bundleno = 486 (0x1e6), region = 64 }
  0xa2   : > { %v420_v0 = vld [vmem:[%s352_s14] sm:$0xff]  ;;  %v422_v1 = vld [vmem:[%s352_s14 + $0x10] sm:$0xff]  ;;  %v421_v2 = vld [vmem:[%s352_s14 + $0x8] sm:$0xff] }
  0xa3   : > { %430 = vadd.xlane.f32.xlu0 %v420_v0  ;;  %434 = vadd.xlane.f32.xlu1 %v422_v1  ;;  %v423_v3 = vld [vmem:[%s352_s14 + $0x18] sm:$0xff]  ;;  %v424_v4 = vld [vmem:[%s352_s14 + $0x20] sm:$0xff]  ;;  %v425_v5 = vld [vmem:[%s352_s14 + $0x28] sm:$0xff] }
  0xa4   : > { %v426_v6 = vld [vmem:[%s352_s14 + $0x30] sm:$0xff]  ;;  %v427_v7 = vld [vmem:[%s352_s14 + $0x38] sm:$0xff] }
  0xa7   : > { %432 = vadd.xlane.f32.xlu0 %v421_v2  ;;  %436 = vadd.xlane.f32.xlu1 %v423_v3 }
  0xab   : > { %438 = vadd.xlane.f32.xlu0 %v424_v4  ;;  %440 = vadd.xlane.f32.xlu1 %v425_v5 }
  0xaf   : > { %442 = vadd.xlane.f32.xlu0 %v426_v6  ;;  %444 = vadd.xlane.f32.xlu1 %v427_v7 }
 0x12c   : > { %v431_v8 = vpop.xlane.xlu0 %430  ;;  %v435_v9 = vpop.xlane.xlu1 %434 }
 0x12d   : > { %v447_v10 = vmul.f32 0.0078125, %v431_v8  ;;  %v449_v11 = vmul.f32 0.0078125, %v435_v9 }
 0x12f   : > { %v3061_v12 = vsub.f32 %v420_v0, %v447_v10  ;;  %v3063_v13 = vsub.f32 %v422_v1, %v449_v11  ;;  %v1813_v0 = vld [vmem:[%s3672_s16] ss:$0 sm:$0xff] }
 0x130   : > { %v433_v14 = vpop.xlane.xlu0 %432  ;;  %v437_v15 = vpop.xlane.xlu1 %436 }
 0x131   : > { %v448_v16 = vmul.f32 0.0078125, %v433_v14  ;;  %v463_v17 = vmul.f32 %v3061_v12, %v3061_v12  ;;  %v450_v18 = vmul.f32 0.0078125, %v437_v15  ;;  %v465_v21 = vmul.f32 %v3063_v13, %v3063_v13 }
 0x133   : > { %v3067_v19 = vsub.f32 %v421_v2, %v448_v16  ;;  %471 = vadd.xlane.f32.xlu0 %v463_v17  ;;  %v3069_v20 = vsub.f32 %v423_v3, %v450_v18  ;;  %v1814_v3 = vld [vmem:[%s3672_s16 + $0x1] ss:$0 sm:$0xff] }
 0x134   : > { %v439_v22 = vpop.xlane.xlu0 %438  ;;  %v441_v23 = vpop.xlane.xlu1 %440 }
 0x135   : > { %v451_v24 = vmul.f32 0.0078125, %v439_v22  ;;  %v464_v25 = vmul.f32 %v3067_v19, %v3067_v19  ;;  %v452_v26 = vmul.f32 0.0078125, %v441_v23  ;;  %v466_v29 = vmul.f32 %v3069_v20, %v3069_v20 }
 0x137   : > { %v3075_v27 = vsub.f32 %v424_v4, %v451_v24  ;;  %475 = vadd.xlane.f32.xlu0 %v465_v21  ;;  %473 = vadd.xlane.f32.xlu1 %v464_v25  ;;  %v3077_v28 = vsub.f32 %v425_v5, %v452_v26 }
 0x138   : > { %v443_v30 = vpop.xlane.xlu0 %442  ;;  %v445_v31 = vpop.xlane.xlu1 %444 }
 0x139   : > { %v453_v32 = vmul.f32 0.0078125, %v443_v30  ;;  %v467_v33 = vmul.f32 %v3075_v27, %v3075_v27  ;;  %v454_v34 = vmul.f32 0.0078125, %v445_v31  ;;  %v468_v37 = vmul.f32 %v3077_v28, %v3077_v28 }
 0x13b   : > { %v3083_v35 = vsub.f32 %v426_v6, %v453_v32  ;;  %477 = vadd.xlane.f32.xlu1 %v466_v29  ;;  %479 = vadd.xlane.f32.xlu0 %v467_v33  ;;  %v3085_v36 = vsub.f32 %v427_v7, %v454_v34 }
 0x13d   : > { %v469_v38 = vmul.f32 %v3083_v35, %v3083_v35  ;;  %v470_v39 = vmul.f32 %v3085_v36, %v3085_v36 }
 0x13f   : > { %481 = vadd.xlane.f32.xlu1 %v468_v37  ;;  %483 = vadd.xlane.f32.xlu0 %v469_v38 }
 0x143   : > { %485 = vadd.xlane.f32.xlu1 %v470_v39 }
 0x1bc   : > { %v472_v40 = vpop.xlane.xlu0 %471 }
 0x1bd   : > { %v487_v41 = vmul.f32 0.0078125, %v472_v40 }
 0x1bf   : > { %v495_v42 = vadd.f32 1e-05, %v487_v41 }
 0x1c0   : > { %v474_v43 = vpop.xlane.xlu1 %473  ;;  %v476_v44 = vpop.xlane.xlu0 %475 }
 0x1c1   : > { %2374 = vrsqrt.f32 %v495_v42  ;;  %v488_v45 = vmul.f32 0.0078125, %v474_v43  ;;  %v489_v46 = vmul.f32 0.0078125, %v476_v44 }
 0x1c3   : > { %v496_v47 = vadd.f32 1e-05, %v488_v45  ;;  %v497_v48 = vadd.f32 1e-05, %v489_v46 }
 0x1c4   : > { %v478_v49 = vpop.xlane.xlu1 %477  ;;  %v480_v50 = vpop.xlane.xlu0 %479 }
 0x1c5   : > { %2376 = vrsqrt.f32 %v496_v47  ;;  %v490_v51 = vmul.f32 0.0078125, %v478_v49  ;;  %v491_v52 = vmul.f32 0.0078125, %v480_v50 }
 0x1c6   : > { %2378 = vrsqrt.f32 %v497_v48 }
 0x1c7   : > { %v498_v53 = vadd.f32 1e-05, %v490_v51  ;;  %v499_v54 = vadd.f32 1e-05, %v491_v52 }
 0x1c8   : > { %v482_v55 = vpop.xlane.xlu1 %481  ;;  %v484_v56 = vpop.xlane.xlu0 %483 }
 0x1c9   : > { %2380 = vrsqrt.f32 %v498_v53  ;;  %v492_v57 = vmul.f32 0.0078125, %v482_v55  ;;  %v493_v58 = vmul.f32 0.0078125, %v484_v56 }
 0x1ca   : > { %2382 = vrsqrt.f32 %v499_v54 }
 0x1cb   : > { %v500_v59 = vadd.f32 1e-05, %v492_v57  ;;  %v501_v60 = vadd.f32 1e-05, %v493_v58 }
 0x1cc   : > { %v486_v61 = vpop.xlane.xlu1 %485 }
 0x1cd   : > { %2384 = vrsqrt.f32 %v500_v59  ;;  %v494_v62 = vmul.f32 0.0078125, %v486_v61 }
 0x1ce   : > { %v2375_v63 = vpop.eup %2374  ;;  %2386 = vrsqrt.f32 %v501_v60 }
 0x1cf   : > { %v511_v1 = vmul.f32 %v2375_v63, %v3061_v12  ;;  %v502_v2 = vadd.f32 1e-05, %v494_v62 }
 0x1d1   : > { %v523_v4 = vmul.f32 %v1813_v0, %v511_v1  ;;  %2388 = vrsqrt.f32 %v502_v2 }
 0x1d2   : > { %v2377_v5 = vpop.eup %2376 }
 0x1d3   : > { %v2379_v6 = vpop.eup %2378  ;;  %v535_v7 = vadd.f32 %v1814_v3, %v523_v4  ;;  %v512_v8 = vmul.f32 %v2377_v5, %v3067_v19 }
 0x1d4   : > { %v513_v9 = vmul.f32 %v2379_v6, %v3063_v13 }
 0x1d5   : > { %543 = vst [vmem:[#allocation5] sm:$0xff] %v535_v7  ;;  %v524_v10 = vmul.f32 %v1813_v0, %v512_v8 }
 0x1d6   : > { %v2381_v11 = vpop.eup %2380  ;;  %v525_v14 = vmul.f32 %v1813_v0, %v513_v9 }
 0x1d7   : > { %v2383_v15 = vpop.eup %2382  ;;  %v536_v12 = vadd.f32 %v1814_v3, %v524_v10  ;;  %v514_v16 = vmul.f32 %v2381_v11, %v3069_v20 }
 0x1d8   : > { %v537_v17 = vadd.f32 %v1814_v3, %v525_v14  ;;  %v515_v18 = vmul.f32 %v2383_v15, %v3075_v27 }
 0x1d9   : > { %544 = vst [vmem:[#allocation5 + $0x18] sm:$0xff] %v536_v12  ;;  %v526_v21 = vmul.f32 %v1813_v0, %v514_v16 }
 0x1da   : > { %v2385_v22 = vpop.eup %2384  ;;  %545 = vst [vmem:[#allocation5 + $0x10] sm:$0xff] %v537_v17  ;;  %v527_v23 = vmul.f32 %v1813_v0, %v515_v18 }
 0x1db   : > { %v2387_v24 = vpop.eup %2386  ;;  %v538_v19 = vadd.f32 %v1814_v3, %v526_v21  ;;  %v516_v13 = vmul.f32 %v2385_v22, %v3077_v28 }
 0x1dc   : > { %v539_v25 = vadd.f32 %v1814_v3, %v527_v23  ;;  %v517_v26 = vmul.f32 %v2387_v24, %v3083_v35 }
 0x1dd   : > { %546 = vst [vmem:[#allocation5 + $0x20] sm:$0xff] %v538_v19  ;;  %v528_v29 = vmul.f32 %v1813_v0, %v516_v13 }
 0x1de   : > { %v2389_v30 = vpop.eup %2388  ;;  %547 = vst [vmem:[#allocation5 + $0x28] sm:$0xff] %v539_v25  ;;  %v529_v20 = vmul.f32 %v1813_v0, %v517_v26 }
 0x1df   : > { %v540_v31 = vadd.f32 %v1814_v3, %v528_v29  ;;  %v518_v27 = vmul.f32 %v2389_v30, %v3085_v36 }
 0x1e0   : > { %v541_v32 = vadd.f32 %v1814_v3, %v529_v20 }
 0x1e1   : > { %548 = vst [vmem:[#allocation5 + $0x8] sm:$0xff] %v540_v31  ;;  %v530_v33 = vmul.f32 %v1813_v0, %v518_v27 }
 0x1e2   : > { %549 = vst [vmem:[#allocation5 + $0x30] sm:$0xff] %v541_v32 }
 0x1e3   : > { %v542_v34 = vadd.f32 %v1814_v3, %v530_v33 }
 0x1e5   : > { %550 = vst [vmem:[#allocation5 + $0x38] sm:$0xff] %v542_v34 }
 0x1e6 PF: > { %v574_v28 = vld [vmem:[%s3044_s29 + $0x78] sm:$0xff]  ;;  %v573_v35 = vld [vmem:[%s3044_s29 + $0x70] sm:$0xff]  ;;  %v572_v36 = vld [vmem:[%s3044_s29 + $0x68] sm:$0xff] }
 0x1e7   : > { %1924 = vmatprep.subr.mxu0 %v574_v28  ;;  %2100 = vmatprep.subr.mxu1 %v574_v28  ;;  %v571_v37 = vld [vmem:[%s3044_s29 + $0x60] sm:$0xff]  ;;  %v570_v38 = vld [vmem:[%s3044_s29 + $0x58] sm:$0xff]  ;;  %v569_v39 = vld [vmem:[%s3044_s29 + $0x50] sm:$0xff] }
 0x1e8   : > { %1925 = vmatpush3.msra.mxu0 %v574_v28  ;;  %2116 = vmatpush3.msra.mxu1 %v574_v28  ;;  %v568_v40 = vld [vmem:[%s3044_s29 + $0x48] sm:$0xff]  ;;  %v567_v41 = vld [vmem:[%s3044_s29 + $0x40] sm:$0xff]  ;;  %v566_v42 = vld [vmem:[%s3044_s29 + $0x38] sm:$0xff] }
 0x1e9   : > { %1926 = vmatprep.subr.mxu0 %v573_v35  ;;  %2101 = vmatprep.subr.mxu1 %v573_v35  ;;  %v565_v43 = vld [vmem:[%s3044_s29 + $0x30] sm:$0xff]  ;;  %v564_v44 = vld [vmem:[%s3044_s29 + $0x28] sm:$0xff]  ;;  %v563_v45 = vld [vmem:[%s3044_s29 + $0x20] sm:$0xff] }
 0x1ea   : > { %1927 = vmatpush3.msra.mxu0 %v573_v35  ;;  %2117 = vmatpush3.msra.mxu1 %v573_v35  ;;  %v562_v46 = vld [vmem:[%s3044_s29 + $0x18] sm:$0xff]  ;;  %v561_v47 = vld [vmem:[%s3044_s29 + $0x10] sm:$0xff]  ;;  %v560_v48 = vld [vmem:[%s3044_s29 + $0x8] sm:$0xff] }
 0x1eb   : > { %1928 = vmatprep.subr.mxu0 %v572_v36  ;;  %2102 = vmatprep.subr.mxu1 %v572_v36  ;;  %v559_v49 = vld [vmem:[%s3044_s29] sm:$0xff]  ;;  %v555_v51 = vld [vmem:[#allocation5 + $0x28] sm:$0xff]  ;;  %v552_v52 = vld [vmem:[#allocation5 + $0x18] sm:$0xff] }
 0x1ec   : > { %1929 = vmatpush3.msra.mxu0 %v572_v36  ;;  %2118 = vmatpush3.msra.mxu1 %v572_v36  ;;  %v551_v50 = vld [vmem:[#allocation5] sm:$0xff]  ;;  %v556_v53 = vld [vmem:[#allocation5 + $0x8] sm:$0xff]  ;;  %v553_v54 = vld [vmem:[#allocation5 + $0x10] sm:$0xff] }
 0x1ed   : > { %1930 = vmatprep.subr.mxu0 %v571_v37  ;;  %2103 = vmatprep.subr.mxu1 %v571_v37  ;;  %v557_v55 = vld [vmem:[#allocation5 + $0x30] sm:$0xff]  ;;  %v554_v56 = vld [vmem:[#allocation5 + $0x20] sm:$0xff]  ;;  %v558_v57 = vld [vmem:[#allocation5 + $0x38] sm:$0xff] }
 0x1ee   : > { %1931 = vmatpush3.msra.mxu0 %v571_v37  ;;  %2119 = vmatpush3.msra.mxu1 %v571_v37  ;;  %v3124_v58 = vld [vmem:[%s3050_s3] sm:$0xff]  ;;  %v3127_v59 = vld [vmem:[%s3050_s3 + $0x8] sm:$0xff]  ;;  %v3130_v60 = vld [vmem:[%s3050_s3 + $0x10] sm:$0xff] }
 0x1ef   : > { %1932 = vmatprep.subr.mxu0 %v570_v38  ;;  %2104 = vmatprep.subr.mxu1 %v570_v38  ;;  %v3133_v61 = vld [vmem:[%s3050_s3 + $0x18] sm:$0xff]  ;;  %v3136_v62 = vld [vmem:[%s3050_s3 + $0x20] sm:$0xff]  ;;  %v3139_v63 = vld [vmem:[%s3050_s3 + $0x28] sm:$0xff] }
 0x1f0   : > { %1933 = vmatpush3.msra.mxu0 %v570_v38  ;;  %2120 = vmatpush3.msra.mxu1 %v570_v38  ;;  %v3142_v0 = vld [vmem:[%s3050_s3 + $0x30] sm:$0xff]  ;;  %v3145_v1 = vld [vmem:[%s3050_s3 + $0x38] sm:$0xff]  ;;  %v3148_v2 = vld [vmem:[%s3050_s3 + $0x40] sm:$0xff] }
 0x1f1   : > { %1934 = vmatprep.subr.mxu0 %v569_v39  ;;  %2105 = vmatprep.subr.mxu1 %v569_v39  ;;  %v3151_v3 = vld [vmem:[%s3050_s3 + $0x48] sm:$0xff]  ;;  %v3154_v4 = vld [vmem:[%s3050_s3 + $0x50] sm:$0xff]  ;;  %v3157_v5 = vld [vmem:[%s3050_s3 + $0x58] sm:$0xff] }
 0x1f2   : > { %1935 = vmatpush3.msra.mxu0 %v569_v39  ;;  %2121 = vmatpush3.msra.mxu1 %v569_v39  ;;  %v3160_v6 = vld [vmem:[%s3050_s3 + $0x60] sm:$0xff]  ;;  %v3163_v7 = vld [vmem:[%s3050_s3 + $0x68] sm:$0xff]  ;;  %v3166_v8 = vld [vmem:[%s3050_s3 + $0x70] sm:$0xff] }
 0x1f3   : > { %1936 = vmatprep.subr.mxu0 %v568_v40  ;;  %2106 = vmatprep.subr.mxu1 %v568_v40  ;;  %v3169_v9 = vld [vmem:[%s3050_s3 + $0x78] sm:$0xff] }
 0x1f4   : > { %1937 = vmatpush3.msra.mxu0 %v568_v40  ;;  %2122 = vmatpush3.msra.mxu1 %v568_v40 }
 0x1f5   : > { %1938 = vmatprep.subr.mxu0 %v567_v41  ;;  %2107 = vmatprep.subr.mxu1 %v567_v41 }
 0x1f6   : > { %1939 = vmatpush3.msra.mxu0 %v567_v41  ;;  %2123 = vmatpush3.msra.mxu1 %v567_v41 }
 0x1f7   : > { %1940 = vmatprep.subr.mxu0 %v566_v42  ;;  %2108 = vmatprep.subr.mxu1 %v566_v42 }
 0x1f8   : > { %1941 = vmatpush3.msra.mxu0 %v566_v42  ;;  %2124 = vmatpush3.msra.mxu1 %v566_v42 }
 0x1f9   : > { %1942 = vmatprep.subr.mxu0 %v565_v43  ;;  %2109 = vmatprep.subr.mxu1 %v565_v43 }
 0x1fa   : > { %1943 = vmatpush3.msra.mxu0 %v565_v43  ;;  %2125 = vmatpush3.msra.mxu1 %v565_v43 }
 0x1fb   : > { %1944 = vmatprep.subr.mxu0 %v564_v44  ;;  %2110 = vmatprep.subr.mxu1 %v564_v44 }
 0x1fc   : > { %1945 = vmatpush3.msra.mxu0 %v564_v44  ;;  %2126 = vmatpush3.msra.mxu1 %v564_v44 }
 0x1fd   : > { %1946 = vmatprep.subr.mxu0 %v563_v45  ;;  %2111 = vmatprep.subr.mxu1 %v563_v45 }
 0x1fe   : > { %1947 = vmatpush3.msra.mxu0 %v563_v45  ;;  %2127 = vmatpush3.msra.mxu1 %v563_v45 }
 0x1ff   : > { %1948 = vmatprep.subr.mxu0 %v562_v46  ;;  %2112 = vmatprep.subr.mxu1 %v562_v46 }
 0x200   : > { %1949 = vmatpush3.msra.mxu0 %v562_v46  ;;  %2128 = vmatpush3.msra.mxu1 %v562_v46 }
 0x201   : > { %1950 = vmatprep.subr.mxu0 %v561_v47  ;;  %2113 = vmatprep.subr.mxu1 %v561_v47 }
 0x202   : > { %1951 = vmatpush3.msra.mxu0 %v561_v47  ;;  %2129 = vmatpush3.msra.mxu1 %v561_v47 }
 0x203   : > { %1952 = vmatprep.subr.mxu0 %v560_v48  ;;  %2114 = vmatprep.subr.mxu1 %v560_v48 }
 0x204   : > { %1953 = vmatpush3.msra.mxu0 %v560_v48  ;;  %2130 = vmatpush3.msra.mxu1 %v560_v48 }
 0x205   : > { %1954 = vmatprep.subr.mxu0 %v559_v49  ;;  %2115 = vmatprep.subr.mxu1 %v559_v49 }
 0x206   : > { %1955 = vmatpush3.msra.mxu0 %v559_v49  ;;  %2131 = vmatpush3.msra.mxu1 %v559_v49 }
 0x207   : > { %1956 = vmatprep.mubr.f32.mxu0 %v551_v50  ;;  %1962 = vmatprep.mubr.f32.mxu1 %v555_v51 }
 0x208   : > { %1957 = vmatmul.mubr.f32.vlgmr.msra.gmra.mxu0 %v552_v52  ;;  %1963 = vmatmul.mubr.f32.vlgmr.msra.gmra.mxu1 %v556_v53 }
 0x209   : > { %1959 = vmatprep.mubr.f32.mxu0 %v553_v54  ;;  %1965 = vmatprep.mubr.f32.mxu1 %v557_v55 }
 0x20c   : > { %1960 = vmatmul.mubr.f32.gmra.mxu0 %v554_v56  ;;  %1966 = vmatmul.mubr.f32.gmra.mxu1 %v558_v57 }
 0x2c8   : > { %v3171_v10 = vpop.f32.mrf.mxu0  ;;  %v3173_v11 = vpop.f32.mrf.mxu1 }
 0x2ca   : > { %v3175_v14 = vpop.f32.mrf.mxu0  ;;  %v3177_v15 = vpop.f32.mrf.mxu1  ;;  %698 = sbr.rel (%p1812_p5) target bundleno = 1085 (0x43d), region = 68 }
 0x2cc   : > { %v3179_v12 = vpop.f32.mrf.mxu0  ;;  %v3181_v16 = vpop.f32.mrf.mxu1 }
 0x2ce   : > { %v3183_v17 = vpop.f32.mrf.mxu0  ;;  %v3185_v18 = vpop.f32.mrf.mxu1 }
 0x2cf   : > { %701 = vmax.xlane.f32.xlu1 %v3171_v10  ;;  %699 = vmax.xlane.f32.xlu0 %v3175_v14  ;;  %vm739_vm0 = vcmask 7168  }
 0x2d0   : > { %1968 = vmatprep.subr.mxu0 %v3169_v9  ;;  %2132 = vmatprep.subr.mxu1 %v3169_v9 }
 0x2d1   : > { %1969 = vmatpush3.msra.mxu0 %v3169_v9  ;;  %2148 = vmatpush3.msra.mxu1 %v3169_v9 }
 0x2d2   : > { %1970 = vmatprep.subr.mxu0 %v3166_v8  ;;  %2133 = vmatprep.subr.mxu1 %v3166_v8 }
 0x2d3   : > { %709 = vmax.xlane.f32.xlu1 %v3173_v11  ;;  %707 = vmax.xlane.f32.xlu0 %v3177_v15 }
 0x2d4   : > { %1971 = vmatpush3.msra.mxu0 %v3166_v8  ;;  %2149 = vmatpush3.msra.mxu1 %v3166_v8 }
 0x2d5   : > { %1972 = vmatprep.subr.mxu0 %v3163_v7  ;;  %2134 = vmatprep.subr.mxu1 %v3163_v7 }
 0x2d6   : > { %1973 = vmatpush3.msra.mxu0 %v3163_v7  ;;  %2150 = vmatpush3.msra.mxu1 %v3163_v7 }
 0x2d7   : > { %711 = vmax.xlane.f32.xlu1 %v3185_v18  ;;  %703 = vmax.xlane.f32.xlu0 %v3183_v17 }
 0x2d8   : > { %1974 = vmatprep.subr.mxu0 %v3160_v6  ;;  %2135 = vmatprep.subr.mxu1 %v3160_v6 }
 0x2d9   : > { %1975 = vmatpush3.msra.mxu0 %v3160_v6  ;;  %2151 = vmatpush3.msra.mxu1 %v3160_v6 }
 0x2da   : > { %1976 = vmatprep.subr.mxu0 %v3157_v5  ;;  %2136 = vmatprep.subr.mxu1 %v3157_v5 }
 0x2db   : > { %713 = vmax.xlane.f32.xlu1 %v3181_v16  ;;  %705 = vmax.xlane.f32.xlu0 %v3179_v12 }
 0x2dc   : > { %1977 = vmatpush3.msra.mxu0 %v3157_v5  ;;  %2152 = vmatpush3.msra.mxu1 %v3157_v5 }
 0x2dd   : > { %1978 = vmatprep.subr.mxu0 %v3154_v4  ;;  %2137 = vmatprep.subr.mxu1 %v3154_v4 }
 0x2de   : > { %1979 = vmatpush3.msra.mxu0 %v3154_v4  ;;  %2153 = vmatpush3.msra.mxu1 %v3154_v4 }
 0x2df   : > { %1980 = vmatprep.subr.mxu0 %v3151_v3  ;;  %2138 = vmatprep.subr.mxu1 %v3151_v3 }
 0x2e0   : > { %1981 = vmatpush3.msra.mxu0 %v3151_v3  ;;  %2154 = vmatpush3.msra.mxu1 %v3151_v3 }
 0x2e1   : > { %1982 = vmatprep.subr.mxu0 %v3148_v2  ;;  %2139 = vmatprep.subr.mxu1 %v3148_v2 }
 0x2e2   : > { %1983 = vmatpush3.msra.mxu0 %v3148_v2  ;;  %2155 = vmatpush3.msra.mxu1 %v3148_v2 }
 0x2e3   : > { %1984 = vmatprep.subr.mxu0 %v3145_v1  ;;  %2140 = vmatprep.subr.mxu1 %v3145_v1 }
 0x2e4   : > { %1985 = vmatpush3.msra.mxu0 %v3145_v1  ;;  %2156 = vmatpush3.msra.mxu1 %v3145_v1 }
 0x2e5   : > { %1986 = vmatprep.subr.mxu0 %v3142_v0  ;;  %2141 = vmatprep.subr.mxu1 %v3142_v0 }
 0x2e6   : > { %1987 = vmatpush3.msra.mxu0 %v3142_v0  ;;  %2157 = vmatpush3.msra.mxu1 %v3142_v0 }
 0x2e7   : > { %1988 = vmatprep.subr.mxu0 %v3139_v63  ;;  %2142 = vmatprep.subr.mxu1 %v3139_v63 }
 0x2e8   : > { %1989 = vmatpush3.msra.mxu0 %v3139_v63  ;;  %2158 = vmatpush3.msra.mxu1 %v3139_v63 }
 0x2e9   : > { %1990 = vmatprep.subr.mxu0 %v3136_v62  ;;  %2143 = vmatprep.subr.mxu1 %v3136_v62 }
 0x2ea   : > { %1991 = vmatpush3.msra.mxu0 %v3136_v62  ;;  %2159 = vmatpush3.msra.mxu1 %v3136_v62 }
 0x2eb   : > { %1992 = vmatprep.subr.mxu0 %v3133_v61  ;;  %2144 = vmatprep.subr.mxu1 %v3133_v61 }
 0x2ec   : > { %1993 = vmatpush3.msra.mxu0 %v3133_v61  ;;  %2160 = vmatpush3.msra.mxu1 %v3133_v61 }
 0x2ed   : > { %1994 = vmatprep.subr.mxu0 %v3130_v60  ;;  %2145 = vmatprep.subr.mxu1 %v3130_v60 }
 0x2ee   : > { %1995 = vmatpush3.msra.mxu0 %v3130_v60  ;;  %2161 = vmatpush3.msra.mxu1 %v3130_v60 }
 0x2ef   : > { %1996 = vmatprep.subr.mxu0 %v3127_v59  ;;  %2146 = vmatprep.subr.mxu1 %v3127_v59 }
 0x2f0   : > { %1997 = vmatpush3.msra.mxu0 %v3127_v59  ;;  %2162 = vmatpush3.msra.mxu1 %v3127_v59 }
 0x2f1   : > { %1998 = vmatprep.subr.mxu0 %v3124_v58  ;;  %2147 = vmatprep.subr.mxu1 %v3124_v58 }
 0x2f2   : > { %1999 = vmatpush3.msra.mxu0 %v3124_v58  ;;  %2163 = vmatpush3.msra.mxu1 %v3124_v58 }
 0x358   : > { %v702_v21 = vpop.xlane.xlu1 %701  ;;  %v700_v22 = vpop.xlane.xlu0 %699 }
 0x359   : > { %v716_v23 = vsub.f32 %v3171_v10, %v702_v21  ;;  %741 = vst.msk [vmem:[#allocation2 + $0x8] sm:$0xff] %vm739_vm0, %v702_v21  ;;  %v715_v24 = vsub.f32 %v3175_v14, %v700_v22  ;;  %740 = vst.msk [vmem:[#allocation2] sm:$0xff] %vm739_vm0, %v700_v22 }
 0x35b   : > { %v725_v19 = vmul.f32 1.442695, %v716_v23  ;;  %v723_v13 = vmul.f32 1.442695, %v715_v24 }
 0x35c   : > { %v710_v25 = vpop.xlane.xlu1 %709  ;;  %v708_v26 = vpop.xlane.xlu0 %707 }
 0x35d   : > { %2390 = vpow2.f32 %v725_v19  ;;  %v720_v29 = vsub.f32 %v3173_v11, %v710_v25  ;;  %745 = vst.msk [vmem:[#allocation2 + $0x28] sm:$0xff] %vm739_vm0, %v710_v25  ;;  %v719_v30 = vsub.f32 %v3177_v15, %v708_v26  ;;  %744 = vst.msk [vmem:[#allocation2 + $0x20] sm:$0xff] %vm739_vm0, %v708_v26 }
 0x35e   : > { %2392 = vpow2.f32 %v723_v13 }
 0x35f   : > { %v733_v20 = vmul.f32 1.442695, %v720_v29  ;;  %v731_v31 = vmul.f32 1.442695, %v719_v30 }
 0x360   : > { %v712_v27 = vpop.xlane.xlu1 %711  ;;  %v704_v32 = vpop.xlane.xlu0 %703 }
 0x361   : > { %2394 = vpow2.f32 %v733_v20  ;;  %v721_v33 = vsub.f32 %v3185_v18, %v712_v27  ;;  %746 = vst.msk [vmem:[#allocation2 + $0x30] sm:$0xff] %vm739_vm0, %v712_v27  ;;  %v717_v34 = vsub.f32 %v3183_v17, %v704_v32  ;;  %742 = vst.msk [vmem:[#allocation2 + $0x10] sm:$0xff] %vm739_vm0, %v704_v32 }
 0x362   : > { %2396 = vpow2.f32 %v731_v31 }
 0x363   : > { %v735_v28 = vmul.f32 1.442695, %v721_v33  ;;  %v727_v35 = vmul.f32 1.442695, %v717_v34 }
 0x364   : > { %v714_v36 = vpop.xlane.xlu1 %713  ;;  %v706_v37 = vpop.xlane.xlu0 %705 }
 0x365   : > { %2398 = vpow2.f32 %v735_v28  ;;  %v722_v38 = vsub.f32 %v3181_v16, %v714_v36  ;;  %747 = vst.msk [vmem:[#allocation2 + $0x38] sm:$0xff] %vm739_vm0, %v714_v36  ;;  %v718_v39 = vsub.f32 %v3179_v12, %v706_v37  ;;  %743 = vst.msk [vmem:[#allocation2 + $0x18] sm:$0xff] %vm739_vm0, %v706_v37 }
 0x366   : > { %2400 = vpow2.f32 %v727_v35 }
 0x367   : > { %v737_v40 = vmul.f32 1.442695, %v722_v38  ;;  %v729_v41 = vmul.f32 1.442695, %v718_v39 }
 0x369   : > { %2402 = vpow2.f32 %v737_v40 }
 0x36a   : > { %v2391_v42 = vpop.eup %2390  ;;  %2404 = vpow2.f32 %v729_v41 }
 0x36b   : > { %v2393_v43 = vpop.eup %2392  ;;  %750 = vadd.xlane.f32.xlu1 %v2391_v42 }
 0x36c   : > { %748 = vadd.xlane.f32.xlu0 %v2393_v43  ;;  %2000 = vmatprep.mubr.f32.mxu0 %v2393_v43 }
 0x36d   : > { %2001 = vmatmul.mubr.f32.vlgmr.msra.gmra.mxu0 %v2391_v42 }
 0x36e   : > { %v2395_v44 = vpop.eup %2394 }
 0x36f   : > { %v2397_v45 = vpop.eup %2396 }
 0x370   : > { %2006 = vmatprep.mubr.f32.mxu1 %v2397_v45 }
 0x371   : > { %2007 = vmatmul.mubr.f32.vlgmr.msra.gmra.mxu1 %v2395_v44 }
 0x372   : > { %v2399_v46 = vpop.eup %2398 }
 0x373   : > { %v2401_v47 = vpop.eup %2400  ;;  %2009 = vmatprep.mubr.f32.mxu1 %v2399_v46 }
 0x374   : > { %752 = vadd.xlane.f32.xlu0 %v2401_v47  ;;  %2003 = vmatprep.mubr.f32.mxu0 %v2401_v47 }
 0x376   : > { %v2403_v48 = vpop.eup %2402 }
 0x377   : > { %v2405_v49 = vpop.eup %2404  ;;  %2010 = vmatmul.mubr.f32.gmra.mxu1 %v2403_v48 }
 0x378   : > { %756 = vadd.xlane.f32.xlu0 %v2397_v45  ;;  %754 = vadd.xlane.f32.xlu1 %v2405_v49 }
 0x379   : > { %2004 = vmatmul.mubr.f32.gmra.mxu0 %v2405_v49 }
 0x37c   : > { %760 = vadd.xlane.f32.xlu0 %v2399_v46  ;;  %758 = vadd.xlane.f32.xlu1 %v2395_v44 }
 0x380   : > { %762 = vadd.xlane.f32.xlu1 %v2403_v48 }
 0x3f4   : > { %v751_v50 = vpop.xlane.xlu1 %750 }
 0x3f5   : > { %765 = vst.msk [vmem:[#allocation3 + $0x8] sm:$0xff] %vm739_vm0, %v751_v50  ;;  %v749_v51 = vpop.xlane.xlu0 %748 }
 0x3f6   : > { %764 = vst.msk [vmem:[#allocation3] sm:$0xff] %vm739_vm0, %v749_v51 }
 0x3fd   : > { %v753_v52 = vpop.xlane.xlu0 %752 }
 0x3fe   : > { %766 = vst.msk [vmem:[#allocation3 + $0x10] sm:$0xff] %vm739_vm0, %v753_v52 }
 0x401   : > { %v755_v53 = vpop.xlane.xlu1 %754  ;;  %v757_v54 = vpop.xlane.xlu0 %756 }
 0x402   : > { %767 = vst.msk [vmem:[#allocation3 + $0x18] sm:$0xff] %vm739_vm0, %v755_v53  ;;  %768 = vst.msk [vmem:[#allocation3 + $0x20] sm:$0xff] %vm739_vm0, %v757_v54 }
 0x405   : > { %v759_v55 = vpop.xlane.xlu1 %758  ;;  %v761_v56 = vpop.xlane.xlu0 %760 }
 0x406   : > { %769 = vst.msk [vmem:[#allocation3 + $0x28] sm:$0xff] %vm739_vm0, %v759_v55  ;;  %770 = vst.msk [vmem:[#allocation3 + $0x30] sm:$0xff] %vm739_vm0, %v761_v56 }
 0x409   : > { %v763_v57 = vpop.xlane.xlu1 %762 }
 0x40a   : > { %771 = vst.msk [vmem:[#allocation3 + $0x38] sm:$0xff] %vm739_vm0, %v763_v57 }
 0x42d   : > { %v2002_v21 = vpop.f32.mrf.mxu0 }
 0x42e   : > { %880 = vst [vmem:[#allocation4] sm:$0xff] %v2002_v21 }
 0x42f   : > { %v838_v22 = vpop.f32.mrf.mxu0 }
 0x430   : > { %879 = vst [vmem:[#allocation4 + $0x30] sm:$0xff] %v838_v22 }
 0x431   : > { %v2008_v23 = vpop.f32.mrf.mxu1 }
 0x432   : > { %884 = vst [vmem:[#allocation4 + $0x20] sm:$0xff] %v2008_v23 }
 0x433   : > { %v858_v24 = vpop.f32.mrf.mxu1 }
 0x434   : > { %883 = vst [vmem:[#allocation4 + $0x8] sm:$0xff] %v858_v24 }
 0x437   : > { %v2011_v19 = vpop.f32.mrf.mxu1 }
 0x438   : > { %886 = vst [vmem:[#allocation4 + $0x38] sm:$0xff] %v2011_v19 }
 0x439   : > { %v2005_v13 = vpop.f32.mrf.mxu0  ;;  %v868_v25 = vpop.f32.mrf.mxu1 }
 0x43a   : > { %882 = vst [vmem:[#allocation4 + $0x10] sm:$0xff] %v2005_v13  ;;  %885 = vst [vmem:[#allocation4 + $0x28] sm:$0xff] %v868_v25 }
 0x43b   : > { %v848_v26 = vpop.f32.mrf.mxu0 }
 0x43c   : > { %881 = vst [vmem:[#allocation4 + $0x18] sm:$0xff] %v848_v26 }
 0x43d PF: > { %s3674_s2 = sld [smem:[#allocation23_spill]] }
 0x443   : > { %p1816_p3 = scmp.le.s32.totalorder %s3674_s2, 0 }
 0x445   : > { %890 = sbr.rel (%p1816_p3) target bundleno = 1606 (0x646), region = 72 }
 0x44a   : > { %899 = vmax.xlane.f32.xlu0 %v3175_v14  ;;  %901 = vmax.xlane.f32.xlu1 %v3171_v10  ;;  %vm1011_vm1 = vcmask 7168   ;;  %v3360_v29 = vld [vmem:[#allocation2 + $0x30] sm:$0xff]  ;;  %v894_v32 = vld [vmem:[#allocation2 + $0x18] sm:$0xff] }
 0x44b   : > { %2012 = vmatprep.subr.mxu0 %v3169_v9  ;;  %2164 = vmatprep.subr.mxu1 %v3169_v9  ;;  %v3367_v33 = vld [vmem:[#allocation2 + $0x38] sm:$0xff] }
 0x44c   : > { %2013 = vmatpush3.msra.mxu0 %v3169_v9  ;;  %2180 = vmatpush3.msra.mxu1 %v3169_v9  ;;  %v893_v9 = vld [vmem:[#allocation2 + $0x10] sm:$0xff] }
 0x44d   : > { %2014 = vmatprep.subr.mxu0 %v3166_v8  ;;  %2165 = vmatprep.subr.mxu1 %v3166_v8 }
 0x44e   : > { %907 = vmax.xlane.f32.xlu0 %v3177_v15  ;;  %909 = vmax.xlane.f32.xlu1 %v3173_v11 }
 0x44f   : > { %2015 = vmatpush3.msra.mxu0 %v3166_v8  ;;  %2181 = vmatpush3.msra.mxu1 %v3166_v8  ;;  %v2737_v8 = vmov 0  }
 0x450   : > { %2016 = vmatprep.subr.mxu0 %v3163_v7  ;;  %2166 = vmatprep.subr.mxu1 %v3163_v7 }
 0x451   : > { %2017 = vmatpush3.msra.mxu0 %v3163_v7  ;;  %2182 = vmatpush3.msra.mxu1 %v3163_v7 }
 0x452   : > { %903 = vmax.xlane.f32.xlu0 %v3183_v17  ;;  %911 = vmax.xlane.f32.xlu1 %v3185_v18 }
 0x453   : > { %2018 = vmatprep.subr.mxu0 %v3160_v6  ;;  %2167 = vmatprep.subr.mxu1 %v3160_v6 }
 0x454   : > { %2019 = vmatpush3.msra.mxu0 %v3160_v6  ;;  %2183 = vmatpush3.msra.mxu1 %v3160_v6 }
 0x455   : > { %2406 = vset.pattern.permute.xlu0 %v2737_v8  ;;  %2407 = vset.pattern.permute.xlu1 %v2737_v8 }
 0x456   : > { %905 = vmax.xlane.f32.xlu0 %v3179_v12  ;;  %913 = vmax.xlane.f32.xlu1 %v3181_v16 }
 0x457   : > { %2020 = vmatprep.subr.mxu0 %v3157_v5  ;;  %2168 = vmatprep.subr.mxu1 %v3157_v5 }
 0x458   : > { %2021 = vmatpush3.msra.mxu0 %v3157_v5  ;;  %2184 = vmatpush3.msra.mxu1 %v3157_v5 }
 0x459   : > { %2022 = vmatprep.subr.mxu0 %v3154_v4  ;;  %2169 = vmatprep.subr.mxu1 %v3154_v4 }
 0x45a   : > { %2023 = vmatpush3.msra.mxu0 %v3154_v4  ;;  %2185 = vmatpush3.msra.mxu1 %v3154_v4 }
 0x45b   : > { %2024 = vmatprep.subr.mxu0 %v3151_v3  ;;  %2170 = vmatprep.subr.mxu1 %v3151_v3 }
 0x45c   : > { %2025 = vmatpush3.msra.mxu0 %v3151_v3  ;;  %2186 = vmatpush3.msra.mxu1 %v3151_v3  ;;  %v896_v3 = vld [vmem:[#allocation2 + $0x28] sm:$0xff] }
 0x45d   : > { %2026 = vmatprep.subr.mxu0 %v3148_v2  ;;  %2171 = vmatprep.subr.mxu1 %v3148_v2 }
 0x45e   : > { %2027 = vmatpush3.msra.mxu0 %v3148_v2  ;;  %2187 = vmatpush3.msra.mxu1 %v3148_v2  ;;  %v895_v2 = vld [vmem:[#allocation2 + $0x20] sm:$0xff] }
 0x45f   : > { %2028 = vmatprep.subr.mxu0 %v3145_v1  ;;  %2172 = vmatprep.subr.mxu1 %v3145_v1 }
 0x460   : > { %2029 = vmatpush3.msra.mxu0 %v3145_v1  ;;  %2188 = vmatpush3.msra.mxu1 %v3145_v1 }
 0x461   : > { %2030 = vmatprep.subr.mxu0 %v3142_v0  ;;  %2173 = vmatprep.subr.mxu1 %v3142_v0 }
 0x462   : > { %2031 = vmatpush3.msra.mxu0 %v3142_v0  ;;  %2189 = vmatpush3.msra.mxu1 %v3142_v0 }
 0x463   : > { %2032 = vmatprep.subr.mxu0 %v3139_v63  ;;  %2174 = vmatprep.subr.mxu1 %v3139_v63 }
 0x464   : > { %2033 = vmatpush3.msra.mxu0 %v3139_v63  ;;  %2190 = vmatpush3.msra.mxu1 %v3139_v63 }
 0x465   : > { %2034 = vmatprep.subr.mxu0 %v3136_v62  ;;  %2175 = vmatprep.subr.mxu1 %v3136_v62 }
 0x466   : > { %2035 = vmatpush3.msra.mxu0 %v3136_v62  ;;  %2191 = vmatpush3.msra.mxu1 %v3136_v62  ;;  %v892_v62 = vld [vmem:[#allocation2 + $0x8] sm:$0xff] }
 0x467   : > { %2036 = vmatprep.subr.mxu0 %v3133_v61  ;;  %2176 = vmatprep.subr.mxu1 %v3133_v61 }
 0x468   : > { %2037 = vmatpush3.msra.mxu0 %v3133_v61  ;;  %2192 = vmatpush3.msra.mxu1 %v3133_v61  ;;  %v891_v61 = vld [vmem:[#allocation2] sm:$0xff] }
 0x469   : > { %2038 = vmatprep.subr.mxu0 %v3130_v60  ;;  %2177 = vmatprep.subr.mxu1 %v3130_v60 }
 0x46a   : > { %2039 = vmatpush3.msra.mxu0 %v3130_v60  ;;  %2193 = vmatpush3.msra.mxu1 %v3130_v60 }
 0x46b   : > { %2040 = vmatprep.subr.mxu0 %v3127_v59  ;;  %2178 = vmatprep.subr.mxu1 %v3127_v59 }
 0x46c   : > { %2041 = vmatpush3.msra.mxu0 %v3127_v59  ;;  %2194 = vmatpush3.msra.mxu1 %v3127_v59 }
 0x46d   : > { %2042 = vmatprep.subr.mxu0 %v3124_v58  ;;  %2179 = vmatprep.subr.mxu1 %v3124_v58 }
 0x46e   : > { %2043 = vmatpush3.msra.mxu0 %v3124_v58  ;;  %2195 = vmatpush3.msra.mxu1 %v3124_v58 }
 0x4d3   : > { %v900_v63 = vpop.xlane.xlu0 %899  ;;  %v902_v60 = vpop.xlane.xlu1 %901 }
 0x4d4   : > { %v915_v0 = vmax.f32 %v891_v61, %v900_v63  ;;  %v916_v1 = vmax.f32 %v892_v62, %v902_v60 }
 0x4d6   : > { %v923_v4 = vsub.f32 %v891_v61, %v915_v0  ;;  %1012 = vst.msk [vmem:[#allocation2] sm:$0xff] %vm1011_vm1, %v915_v0  ;;  %949 = vperm.xlu0 %2406, %v915_v0   ;;  %1013 = vst.msk [vmem:[#allocation2 + $0x8] sm:$0xff] %vm1011_vm1, %v916_v1  ;;  %v924_v36 = vsub.f32 %v892_v62, %v916_v1 }
 0x4d7   : > { %v908_v59 = vpop.xlane.xlu0 %907  ;;  %v910_v5 = vpop.xlane.xlu1 %909 }
 0x4d8   : > { %v931_v6 = vmul.f32 1.442695, %v923_v4  ;;  %v919_v7 = vmax.f32 %v895_v2, %v908_v59  ;;  %v920_v58 = vmax.f32 %v896_v3, %v910_v5  ;;  %v933_v42 = vmul.f32 1.442695, %v924_v36 }
 0x4da   : > { %2408 = vpow2.f32 %v931_v6  ;;  %1016 = vst.msk [vmem:[#allocation2 + $0x20] sm:$0xff] %vm1011_vm1, %v919_v7  ;;  %969 = vperm.xlu1 %2407, %v919_v7   ;;  %1017 = vst.msk [vmem:[#allocation2 + $0x28] sm:$0xff] %vm1011_vm1, %v920_v58  ;;  %v928_v39 = vsub.f32 %v896_v3, %v920_v58  ;;  %v927_v47 = vsub.f32 %v895_v2, %v919_v7 }
 0x4db   : > { %v904_v30 = vpop.xlane.xlu0 %903  ;;  %v912_v20 = vpop.xlane.xlu1 %911 }
 0x4dc   : > { %v917_v31 = vmax.f32 %v893_v9, %v904_v30  ;;  %v3365_v27 = vmax.f32 %v3360_v29, %v912_v20  ;;  %v941_v45 = vmul.f32 1.442695, %v928_v39  ;;  %v939_v49 = vmul.f32 1.442695, %v927_v47 }
 0x4de   : > { %1014 = vst.msk [vmem:[#allocation2 + $0x10] sm:$0xff] %vm1011_vm1, %v917_v31  ;;  %954 = vperm.xlu1 %2407, %v916_v1   ;;  %v929_v34 = vsub.f32 %v3360_v29, %v3365_v27  ;;  %1018 = vst.msk [vmem:[#allocation2 + $0x30] sm:$0xff] %vm1011_vm1, %v3365_v27  ;;  %v925_v43 = vsub.f32 %v893_v9, %v917_v31 }
 0x4df   : > { %v906_v28 = vpop.xlane.xlu0 %905  ;;  %v914_v35 = vpop.xlane.xlu1 %913 }
 0x4e0   : > { %v918_v37 = vmax.f32 %v894_v32, %v906_v28  ;;  %v3375_v38 = vmax.f32 %v3367_v33, %v914_v35  ;;  %v935_v48 = vmul.f32 1.442695, %v925_v43  ;;  %v1020_v35 = vld [vmem:[#allocation3] sm:$0xff] }
 0x4e2   : > { %v926_v40 = vsub.f32 %v894_v32, %v918_v37  ;;  %1015 = vst.msk [vmem:[#allocation2 + $0x18] sm:$0xff] %vm1011_vm1, %v918_v37  ;;  %974 = vperm.xlu1 %2407, %v920_v58   ;;  %v930_v41 = vsub.f32 %v3367_v33, %v3375_v38  ;;  %1019 = vst.msk [vmem:[#allocation2 + $0x38] sm:$0xff] %vm1011_vm1, %v3375_v38  ;;  %v943_v58 = vmul.f32 1.442695, %v929_v34  ;;  %v1021_v34 = vld [vmem:[#allocation3 + $0x8] sm:$0xff] }
 0x4e4   : > { %v937_v44 = vmul.f32 1.442695, %v926_v40 }
 0x4e6   : > { %2410 = vpow2.f32 %v937_v44  ;;  %959 = vperm.xlu1 %2407, %v917_v31   ;;  %v1024_v44 = vld [vmem:[#allocation3 + $0x20] sm:$0xff] }
 0x4e7   : > { %v3382_v46 = vpop.eup %2408  ;;  %2412 = vpow2.f32 %v933_v42 }
 0x4e8   : > { %1080 = vperm.xlu0 %2406, %v3382_v46   ;;  %2414 = vpow2.f32 %v941_v45  ;;  %v1028_v33 = vmul.f32 %v3382_v46, %v1020_v35 }
 0x4e9   : > { %2416 = vpow2.f32 %v935_v48  ;;  %v1023_v48 = vld [vmem:[#allocation3 + $0x18] sm:$0xff] }
 0x4ea   : > { %979 = vperm.xlu1 %2407, %v3365_v27   ;;  %2418 = vpow2.f32 %v939_v49 }
 0x4ee   : > { %964 = vperm.xlu1 %2407, %v918_v37  }
 0x4f2   : > { %984 = vperm.xlu1 %2407, %v3375_v38  }
 0x4f3   : > { %v3387_v50 = vpop.eup %2410 }
 0x4f4   : > { %1095 = vperm.xlu0 %2406, %v3387_v50   ;;  %v3390_v51 = vpop.eup %2412 }
 0x4f5   : > { %v3393_v52 = vpop.eup %2414  ;;  %v1029_v38 = vmul.f32 %v3390_v51, %v1021_v34 }
 0x4f6   : > { %1085 = vperm.xlu1 %2407, %v3390_v51   ;;  %v3396_v53 = vpop.eup %2416  ;;  %v1031_v51 = vmul.f32 %v3387_v50, %v1023_v48 }
 0x4f7   : > { %v3399_v54 = vpop.eup %2418 }
 0x4f8   : > { %1105 = vperm.xlu0 %2406, %v3393_v52   ;;  %v1032_v46 = vmul.f32 %v3399_v54, %v1024_v44 }
 0x4fa   : > { %1090 = vperm.xlu1 %2407, %v3396_v53  }
 0x4fe   : > { %1100 = vperm.xlu1 %2407, %v3399_v54  }
 0x551   : > { %v950_v55 = vpop.permute.xlu0 %949 }
 0x552   : > { %v987_v56 = vsub.f32 %v3175_v14, %v950_v55  ;;  %v1026_v55 = vld [vmem:[#allocation3 + $0x30] sm:$0xff] }
 0x554   : > { %v995_v57 = vmul.f32 1.442695, %v987_v56 }
 0x555   : > { %v970_v21 = vpop.permute.xlu1 %969 }
 0x556   : > { %2420 = vpow2.f32 %v995_v57  ;;  %v991_v22 = vsub.f32 %v3177_v15, %v970_v21  ;;  %v1025_v21 = vld [vmem:[#allocation3 + $0x28] sm:$0xff] }
 0x558   : > { %v1003_v23 = vmul.f32 1.442695, %v991_v22 }
 0x559   : > { %v955_v24 = vpop.permute.xlu1 %954 }
 0x55a   : > { %2422 = vpow2.f32 %v1003_v23  ;;  %v988_v19 = vsub.f32 %v3171_v10, %v955_v24  ;;  %v1033_v24 = vmul.f32 %v3393_v52, %v1025_v21  ;;  %v1074_v52 = vld [vmem:[#allocation4 + $0x8] sm:$0xff] }
 0x55c   : > { %v997_v13 = vmul.f32 1.442695, %v988_v19  ;;  %v1027_v19 = vld [vmem:[#allocation3 + $0x38] sm:$0xff] }
 0x55d   : > { %v975_v25 = vpop.permute.xlu1 %974 }
 0x55e   : > { %2424 = vpow2.f32 %v997_v13  ;;  %v992_v26 = vsub.f32 %v3173_v11, %v975_v25 }
 0x560   : > { %v1005_v8 = vmul.f32 1.442695, %v992_v26 }
 0x561   : > { %v960_v61 = vpop.permute.xlu1 %959 }
 0x562   : > { %2426 = vpow2.f32 %v1005_v8  ;;  %v989_v14 = vsub.f32 %v3183_v17, %v960_v61  ;;  %v1071_v8 = vld [vmem:[#allocation4] sm:$0xff]  ;;  %v1070_v61 = vld [vmem:[#allocation4 + $0x30] sm:$0xff] }
 0x563   : > { %v2421_v62 = vpop.eup %2420  ;;  %v1081_v32 = vpop.permute.xlu0 %1080 }
 0x564   : > { %v999_v63 = vmul.f32 1.442695, %v989_v14  ;;  %1036 = vadd.xlane.f32.xlu1 %v2421_v62  ;;  %2044 = vmatprep.mubr.f32.mxu0 %v2421_v62  ;;  %v1075_v62 = vld [vmem:[#allocation4 + $0x20] sm:$0xff] }
 0x565   : > { %v980_v15 = vpop.permute.xlu1 %979 }
 0x566   : > { %2428 = vpow2.f32 %v999_v63  ;;  %v993_v60 = vsub.f32 %v3185_v18, %v980_v15  ;;  %v1118_v15 = vmul.f32 %v1081_v32, %v1070_v61 }
 0x567   : > { %v2423_v0 = vpop.eup %2422 }
 0x568   : > { %v1007_v10 = vmul.f32 1.442695, %v993_v60  ;;  %2050 = vmatprep.mubr.f32.mxu1 %v2423_v0 }
 0x569   : > { %v965_v1 = vpop.permute.xlu1 %964 }
 0x56a   : > { %2430 = vpow2.f32 %v1007_v10  ;;  %v990_v11 = vsub.f32 %v3179_v12, %v965_v1 }
 0x56b   : > { %v2425_v2 = vpop.eup %2424 }
 0x56c   : > { %v1001_v3 = vmul.f32 1.442695, %v990_v11  ;;  %2045 = vmatmul.mubr.f32.vlgmr.msra.gmra.mxu0 %v2425_v2  ;;  %1038 = vadd.xlane.f32.xlu0 %v2425_v2 }
 0x56d   : > { %v985_v17 = vpop.permute.xlu1 %984 }
 0x56e   : > { %2432 = vpow2.f32 %v1001_v3  ;;  %v994_v4 = vsub.f32 %v3181_v16, %v985_v17  ;;  %v945_v16 = vmul.f32 1.442695, %v930_v41  ;;  %v1022_v41 = vld [vmem:[#allocation3 + $0x10] sm:$0xff] }
 0x56f   : > { %v2427_v59 = vpop.eup %2426  ;;  %v3418_v36 = vpop.permute.xlu0 %1095  ;;  %v1030_v42 = vmul.f32 %v3396_v53, %v1022_v41 }
 0x570   : > { %v1009_v5 = vmul.f32 1.442695, %v994_v4  ;;  %2051 = vmatmul.mubr.f32.vlgmr.msra.gmra.mxu1 %v2427_v59 }
 0x571   : > { %v1086_v20 = vpop.permute.xlu1 %1085 }
 0x572   : > { %2434 = vpow2.f32 %v1009_v5  ;;  %v1119_v14 = vmul.f32 %v1086_v20, %v1071_v8  ;;  %v1072_v5 = vld [vmem:[#allocation4 + $0x18] sm:$0xff] }
 0x573   : > { %v2429_v18 = vpop.eup %2428  ;;  %2436 = vpow2.f32 %v945_v16  ;;  %v1106_v27 = vpop.permute.xlu0 %1105 }
 0x574   : > { %2047 = vmatprep.mubr.f32.mxu0 %v2429_v18  ;;  %1040 = vadd.xlane.f32.xlu0 %v2429_v18  ;;  %2438 = vpow2.f32 %v943_v58  ;;  %v1123_v10 = vmul.f32 %v1106_v27, %v1075_v62 }
 0x575   : > { %v3416_v31 = vpop.permute.xlu1 %1090 }
 0x576   : > { %v1120_v16 = vmul.f32 %v3416_v31, %v1072_v5 }
 0x577   : > { %v2431_v6 = vpop.eup %2430 }
 0x578   : > { %2053 = vmatprep.mubr.f32.mxu1 %v2431_v6  ;;  %1044 = vadd.xlane.f32.xlu0 %v2423_v0 }
 0x579   : > { %v1101_v28 = vpop.permute.xlu1 %1100 }
 0x57a   : > { %v1122_v2 = vmul.f32 %v1101_v28, %v1074_v52 }
 0x57b   : > { %v2433_v7 = vpop.eup %2432 }
 0x57c   : > { %1042 = vadd.xlane.f32.xlu1 %v2433_v7  ;;  %2048 = vmatmul.mubr.f32.gmra.mxu0 %v2433_v7 }
 0x57d   : > { %1048 = vadd.xlane.f32.xlu0 %v2431_v6  ;;  %v1077_v6 = vld [vmem:[#allocation4 + $0x38] sm:$0xff] }
 0x57f   : > { %v2435_v12 = vpop.eup %2434 }
 0x580   : > { %2054 = vmatmul.mubr.f32.gmra.mxu1 %v2435_v12  ;;  %1046 = vadd.xlane.f32.xlu1 %v2427_v59  ;;  %v2437_v9 = vpop.eup %2436  ;;  %v1073_v59 = vld [vmem:[#allocation4 + $0x10] sm:$0xff] }
 0x581   : > { %v2439_v30 = vpop.eup %2438  ;;  %v1035_v25 = vmul.f32 %v2437_v9, %v1027_v19  ;;  %v1121_v18 = vmul.f32 %v3418_v36, %v1073_v59 }
 0x582   : > { %v1034_v57 = vmul.f32 %v2439_v30, %v1026_v55 }
 0x584   : > { %1050 = vadd.xlane.f32.xlu1 %v2435_v12 }
 0x593   : > { %1115 = vperm.xlu0 %2406, %v2437_v9   ;;  %v1076_v9 = vld [vmem:[#allocation4 + $0x28] sm:$0xff] }
 0x595   : > { %1110 = vperm.xlu1 %2407, %v2439_v30  }
 0x5ed   : > { %v1037_v37 = vpop.xlane.xlu1 %1036 }
 0x5ee   : > { %v1052_v29 = vadd.f32 %v1037_v37, %v1028_v33 }
 0x5f0   : > { %1060 = vst.msk [vmem:[#allocation3] sm:$0xff] %vm1011_vm1, %v1052_v29 }
 0x5f5   : > { %v1039_v39 = vpop.xlane.xlu0 %1038 }
 0x5f6   : > { %v1053_v40 = vadd.f32 %v1039_v39, %v1029_v38 }
 0x5f8   : > { %1061 = vst.msk [vmem:[#allocation3 + $0x8] sm:$0xff] %vm1011_vm1, %v1053_v40 }
 0x5fd   : > { %v1041_v43 = vpop.xlane.xlu0 %1040 }
 0x5fe   : > { %v1054_v45 = vadd.f32 %v1041_v43, %v1030_v42 }
 0x600   : > { %1062 = vst.msk [vmem:[#allocation3 + $0x10] sm:$0xff] %vm1011_vm1, %v1054_v45 }
 0x601   : > { %v1045_v47 = vpop.xlane.xlu0 %1044 }
 0x602   : > { %v1056_v49 = vadd.f32 %v1045_v47, %v1032_v46 }
 0x604   : > { %1064 = vst.msk [vmem:[#allocation3 + $0x20] sm:$0xff] %vm1011_vm1, %v1056_v49 }
 0x605   : > { %v1043_v56 = vpop.xlane.xlu1 %1042 }
 0x606   : > { %v1055_v22 = vadd.f32 %v1043_v56, %v1031_v51  ;;  %v1049_v53 = vpop.xlane.xlu0 %1048 }
 0x607   : > { %v1058_v23 = vadd.f32 %v1049_v53, %v1034_v57 }
 0x608   : > { %1063 = vst.msk [vmem:[#allocation3 + $0x18] sm:$0xff] %vm1011_vm1, %v1055_v22 }
 0x609   : > { %1066 = vst.msk [vmem:[#allocation3 + $0x30] sm:$0xff] %vm1011_vm1, %v1058_v23  ;;  %v1047_v54 = vpop.xlane.xlu1 %1046 }
 0x60a   : > { %v1057_v13 = vadd.f32 %v1047_v54, %v1033_v24 }
 0x60c   : > { %1065 = vst.msk [vmem:[#allocation3 + $0x28] sm:$0xff] %vm1011_vm1, %v1057_v13 }
 0x60d   : > { %v1051_v26 = vpop.xlane.xlu1 %1050 }
 0x60e   : > { %v1059_v50 = vadd.f32 %v1051_v26, %v1035_v25  ;;  %v1116_v7 = vpop.permute.xlu0 %1115 }
 0x60f   : > { %v1125_v32 = vmul.f32 %v1116_v7, %v1077_v6 }
 0x610   : > { %1067 = vst.msk [vmem:[#allocation3 + $0x38] sm:$0xff] %vm1011_vm1, %v1059_v50 }
 0x611   : > { %v1111_v30 = vpop.permute.xlu1 %1110 }
 0x612   : > { %v1124_v33 = vmul.f32 %v1111_v30, %v1076_v9 }
 0x62c   : > { %v2046_v63 = vpop.f32.mrf.mxu0 }
 0x62d   : > { %v1232_v60 = vadd.f32 %v2046_v63, %v1119_v14 }
 0x62e   : > { %v1192_v0 = vpop.f32.mrf.mxu0 }
 0x62f   : > { %1240 = vst [vmem:[#allocation4] sm:$0xff] %v1232_v60  ;;  %v1231_v1 = vadd.f32 %v1192_v0, %v1118_v15 }
 0x630   : > { %v2052_v11 = vpop.f32.mrf.mxu1 }
 0x631   : > { %1239 = vst [vmem:[#allocation4 + $0x30] sm:$0xff] %v1231_v1  ;;  %v1236_v3 = vadd.f32 %v2052_v11, %v1123_v10 }
 0x632   : > { %v1212_v17 = vpop.f32.mrf.mxu1 }
 0x633   : > { %1244 = vst [vmem:[#allocation4 + $0x20] sm:$0xff] %v1236_v3  ;;  %v1235_v4 = vadd.f32 %v1212_v17, %v1122_v2 }
 0x635   : > { %1243 = vst [vmem:[#allocation4 + $0x8] sm:$0xff] %v1235_v4 }
 0x63c   : > { %v2049_v12 = vpop.f32.mrf.mxu0 }
 0x63d   : > { %v1234_v58 = vadd.f32 %v2049_v12, %v1121_v18 }
 0x63e   : > { %v1202_v20 = vpop.f32.mrf.mxu0 }
 0x63f   : > { %1242 = vst [vmem:[#allocation4 + $0x10] sm:$0xff] %v1234_v58  ;;  %v1233_v28 = vadd.f32 %v1202_v20, %v1120_v16 }
 0x640   : > { %v2055_v35 = vpop.f32.mrf.mxu1 }
 0x641   : > { %1241 = vst [vmem:[#allocation4 + $0x18] sm:$0xff] %v1233_v28  ;;  %v1238_v37 = vadd.f32 %v2055_v35, %v1125_v32 }
 0x642   : > { %v1222_v29 = vpop.f32.mrf.mxu1 }
 0x643   : > { %1246 = vst [vmem:[#allocation4 + $0x38] sm:$0xff] %v1238_v37  ;;  %v1237_v27 = vadd.f32 %v1222_v29, %v1124_v33 }
 0x645   : > { %1245 = vst [vmem:[#allocation4 + $0x28] sm:$0xff] %v1237_v27 }
 0x646 PF: > { %s3675_s17 = sld [smem:[#allocation23_spill]] }
 0x64c   : > { %p1247_p2 = scmp.eq.s32.totalorder %s3675_s17, 1  ;;  %p1817_p10 = scmp.ne.s32.totalorder %s3675_s17, 1 }
 0x64e   : > { %1250 = sbr.rel (%p1817_p10) target bundleno = 1774 (0x6ee), region = 76 }
 0x653   : > { %v1263_v31 = vld [vmem:[#allocation3 + $0x10] sm:$0xff]  ;;  %v1261_v36 = vld [vmem:[#allocation3] sm:$0xff]  ;;  %v1264_v34 = vld [vmem:[#allocation3 + $0x18] sm:$0xff]  ;;  %v2738_v38 = vmov 0  }
 0x654   : > { %2441 = vset.pattern.permute.xlu1 %v2738_v38  ;;  %2440 = vset.pattern.permute.xlu0 %v2738_v38  ;;  %2442 = vrcp.f32 %v1263_v31  ;;  %v1262_v39 = vld [vmem:[#allocation3 + $0x8] sm:$0xff]  ;;  %v1265_v41 = vld [vmem:[#allocation3 + $0x20] sm:$0xff]  ;;  %v1268_v42 = vld [vmem:[#allocation3 + $0x38] sm:$0xff] }
 0x655   : > { %2444 = vrcp.f32 %v1261_v36  ;;  %v1266_v40 = vld [vmem:[#allocation3 + $0x28] sm:$0xff]  ;;  %v1267_v43 = vld [vmem:[#allocation3 + $0x30] sm:$0xff]  ;;  %v1255_v56 = vld [vmem:[#allocation4 + $0x18] sm:$0xff] }
 0x656   : > { %2446 = vrcp.f32 %v1264_v34  ;;  %v1253_v57 = vld [vmem:[#allocation4 + $0x30] sm:$0xff]  ;;  %v1254_v54 = vld [vmem:[#allocation4] sm:$0xff]  ;;  %v1257_v8 = vld [vmem:[#allocation4 + $0x8] sm:$0xff] }
 0x657   : > { %2448 = vrcp.f32 %v1262_v39  ;;  %v1256_v24 = vld [vmem:[#allocation4 + $0x10] sm:$0xff]  ;;  %v1258_v50 = vld [vmem:[#allocation4 + $0x20] sm:$0xff]  ;;  %v1260_v15 = vld [vmem:[#allocation4 + $0x38] sm:$0xff] }
 0x658   : > { %2450 = vrcp.f32 %v1266_v40  ;;  %v1259_v60 = vld [vmem:[#allocation4 + $0x28] sm:$0xff] }
 0x659   : > { %2452 = vrcp.f32 %v1265_v41 }
 0x65a   : > { %2454 = vrcp.f32 %v1268_v42 }
 0x65b   : > { %2456 = vrcp.f32 %v1267_v43 }
 0x661   : > { %v2443_v44 = vpop.eup %2442 }
 0x662   : > { %v2445_v45 = vpop.eup %2444  ;;  %1289 = vperm.xlu1 %2441, %v2443_v44  }
 0x663   : > { %v2447_v46 = vpop.eup %2446  ;;  %1279 = vperm.xlu0 %2440, %v2445_v45  }
 0x664   : > { %v2449_v47 = vpop.eup %2448 }
 0x665   : > { %v2451_v48 = vpop.eup %2450 }
 0x666   : > { %1294 = vperm.xlu1 %2441, %v2447_v46   ;;  %v2453_v49 = vpop.eup %2452 }
 0x667   : > { %1284 = vperm.xlu0 %2440, %v2449_v47   ;;  %v2455_v55 = vpop.eup %2454 }
 0x668   : > { %v2457_v51 = vpop.eup %2456 }
 0x66a   : > { %1304 = vperm.xlu1 %2441, %v2451_v48  }
 0x66b   : > { %1299 = vperm.xlu0 %2440, %v2453_v49  }
 0x66e   : > { %1314 = vperm.xlu1 %2441, %v2455_v55  }
 0x66f   : > { %1309 = vperm.xlu0 %2440, %v2457_v51  }
 0x6dd   : > { %v1290_v21 = vpop.permute.xlu1 %1289 }
 0x6de   : > { %v1319_v22 = vmul.f32 %v1290_v21, %v1255_v56  ;;  %v1280_v53 = vpop.permute.xlu0 %1279 }
 0x6df   : > { %v1317_v23 = vmul.f32 %v1280_v53, %v1253_v57 }
 0x6e0   : > { %1327 = vst [vmem:[#allocation4 + $0x18] sm:$0xff] %v1319_v22 }
 0x6e1   : > { %1325 = vst [vmem:[#allocation4 + $0x30] sm:$0xff] %v1317_v23  ;;  %v1295_v19 = vpop.permute.xlu1 %1294 }
 0x6e2   : > { %v1320_v13 = vmul.f32 %v1295_v19, %v1256_v24  ;;  %v1285_v25 = vpop.permute.xlu0 %1284 }
 0x6e3   : > { %v1318_v26 = vmul.f32 %v1285_v25, %v1254_v54 }
 0x6e4   : > { %1328 = vst [vmem:[#allocation4 + $0x10] sm:$0xff] %v1320_v13 }
 0x6e5   : > { %1326 = vst [vmem:[#allocation4] sm:$0xff] %v1318_v26  ;;  %v1305_v61 = vpop.permute.xlu1 %1304 }
 0x6e6   : > { %v1322_v14 = vmul.f32 %v1305_v61, %v1258_v50  ;;  %v1300_v62 = vpop.permute.xlu0 %1299 }
 0x6e7   : > { %v1321_v63 = vmul.f32 %v1300_v62, %v1257_v8 }
 0x6e8   : > { %1330 = vst [vmem:[#allocation4 + $0x20] sm:$0xff] %v1322_v14 }
 0x6e9   : > { %1329 = vst [vmem:[#allocation4 + $0x8] sm:$0xff] %v1321_v63  ;;  %v1315_v52 = vpop.permute.xlu1 %1314 }
 0x6ea   : > { %v1324_v0 = vmul.f32 %v1315_v52, %v1260_v15  ;;  %v1310_v10 = vpop.permute.xlu0 %1309 }
 0x6eb   : > { %v1323_v1 = vmul.f32 %v1310_v10, %v1259_v60 }
 0x6ec   : > { %1332 = vst [vmem:[#allocation4 + $0x38] sm:$0xff] %v1324_v0 }
 0x6ed   : > { %1331 = vst [vmem:[#allocation4 + $0x28] sm:$0xff] %v1323_v1 }
 0x6ee PF: > { %1337 = sbr.rel (!%p1247_p2) target bundleno = 2293 (0x8f5), region = 80  ;;  %v1338_v11 = vld [vmem:[#allocation4 + $0x30] sm:$0xff] (%p1247_p2)  ;;  %v1339_v2 = vld [vmem:[#allocation4] sm:$0xff] (%p1247_p2)  ;;  %v1340_v4 = vld [vmem:[#allocation4 + $0x18] sm:$0xff] (%p1247_p2)  ;;  %s3677_s1 = sld [smem:[#allocation38_spill]] (%p1247_p2) }
 0x6ef   : > { %1346 = vadd.xlane.f32.xlu0 (%p1247_p2), %v1338_v11  ;;  %1348 = vadd.xlane.f32.xlu1 (%p1247_p2), %v1339_v2  ;;  %v1343_v17 = vld [vmem:[#allocation4 + $0x20] sm:$0xff] (%p1247_p2)  ;;  %v1341_v5 = vld [vmem:[#allocation4 + $0x10] sm:$0xff] (%p1247_p2)  ;;  %v1491_v6 = vld [vmem:[#allocation13 + $0x78] sm:$0xff] (%p1247_p2) }
 0x6f0   : > { %v1342_v3 = vld [vmem:[#allocation4 + $0x8] sm:$0xff] (%p1247_p2)  ;;  %v1490_v7 = vld [vmem:[#allocation13 + $0x70] sm:$0xff] (%p1247_p2)  ;;  %2056 = vmatprep.subr.mxu0 (%p1247_p2), %v1491_v6  ;;  %2196 = vmatprep.subr.mxu1 (%p1247_p2), %v1491_v6  ;;  %v1488_v21 = vld [vmem:[#allocation13 + $0x60] sm:$0xff] (%p1247_p2) }
 0x6f1   : > { %2057 = vmatpush3.msra.mxu0 (%p1247_p2), %v1491_v6  ;;  %2212 = vmatpush3.msra.mxu1 (%p1247_p2), %v1491_v6  ;;  %v1489_v56 = vld [vmem:[#allocation13 + $0x68] sm:$0xff] (%p1247_p2)  ;;  %v1487_v53 = vld [vmem:[#allocation13 + $0x58] sm:$0xff] (%p1247_p2)  ;;  %v1486_v23 = vld [vmem:[#allocation13 + $0x50] sm:$0xff] (%p1247_p2) }
 0x6f2   : > { %2058 = vmatprep.subr.mxu0 (%p1247_p2), %v1490_v7  ;;  %2197 = vmatprep.subr.mxu1 (%p1247_p2), %v1490_v7  ;;  %v1485_v24 = vld [vmem:[#allocation13 + $0x48] sm:$0xff] (%p1247_p2)  ;;  %v1484_v54 = vld [vmem:[#allocation13 + $0x40] sm:$0xff] (%p1247_p2)  ;;  %v1483_v19 = vld [vmem:[#allocation13 + $0x38] sm:$0xff] (%p1247_p2) }
 0x6f3   : > { %1354 = vadd.xlane.f32.xlu0 %v1342_v3  ;;  %1356 = vadd.xlane.f32.xlu1 %v1343_v17  ;;  %v1345_v18 = vld [vmem:[#allocation4 + $0x38] sm:$0xff]  ;;  %v1482_v13 = vld [vmem:[#allocation13 + $0x30] sm:$0xff]  ;;  %v1481_v25 = vld [vmem:[#allocation13 + $0x28] sm:$0xff] }
 0x6f4   : > { %v1344_v59 = vld [vmem:[#allocation4 + $0x28] sm:$0xff]  ;;  %2059 = vmatpush3.msra.mxu0 %v1490_v7  ;;  %2213 = vmatpush3.msra.mxu1 %v1490_v7  ;;  %v1480_v26 = vld [vmem:[#allocation13 + $0x20] sm:$0xff]  ;;  %v1479_v50 = vld [vmem:[#allocation13 + $0x18] sm:$0xff] }
 0x6f5   : > { %2060 = vmatprep.subr.mxu0 %v1489_v56  ;;  %2198 = vmatprep.subr.mxu1 %v1489_v56  ;;  %v1478_v8 = vld [vmem:[#allocation13 + $0x10] sm:$0xff]  ;;  %v1477_v61 = vld [vmem:[#allocation13 + $0x8] sm:$0xff]  ;;  %v1476_v14 = vld [vmem:[#allocation13] sm:$0xff] }
 0x6f6   : > { %2061 = vmatpush3.msra.mxu0 %v1489_v56  ;;  %2214 = vmatpush3.msra.mxu1 %v1489_v56 }
 0x6f7   : > { %1350 = vadd.xlane.f32.xlu0 %v1340_v4  ;;  %1358 = vadd.xlane.f32.xlu1 %v1344_v59 }
 0x6f8   : > { %2062 = vmatprep.subr.mxu0 %v1488_v21  ;;  %2199 = vmatprep.subr.mxu1 %v1488_v21 }
 0x6f9   : > { %2063 = vmatpush3.msra.mxu0 %v1488_v21  ;;  %2215 = vmatpush3.msra.mxu1 %v1488_v21 }
 0x6fa   : > { %2064 = vmatprep.subr.mxu0 %v1487_v53  ;;  %2200 = vmatprep.subr.mxu1 %v1487_v53 }
 0x6fb   : > { %1352 = vadd.xlane.f32.xlu0 %v1341_v5  ;;  %1360 = vadd.xlane.f32.xlu1 %v1345_v18 }
 0x6fc   : > { %2065 = vmatpush3.msra.mxu0 %v1487_v53  ;;  %2216 = vmatpush3.msra.mxu1 %v1487_v53 }
 0x6fd   : > { %2066 = vmatprep.subr.mxu0 %v1486_v23  ;;  %2201 = vmatprep.subr.mxu1 %v1486_v23 }
 0x6fe   : > { %2067 = vmatpush3.msra.mxu0 %v1486_v23  ;;  %2217 = vmatpush3.msra.mxu1 %v1486_v23 }
 0x6ff   : > { %2068 = vmatprep.subr.mxu0 %v1485_v24  ;;  %2202 = vmatprep.subr.mxu1 %v1485_v24 }
 0x700   : > { %2069 = vmatpush3.msra.mxu0 %v1485_v24  ;;  %2218 = vmatpush3.msra.mxu1 %v1485_v24 }
 0x701   : > { %2070 = vmatprep.subr.mxu0 %v1484_v54  ;;  %2203 = vmatprep.subr.mxu1 %v1484_v54 }
 0x702   : > { %2071 = vmatpush3.msra.mxu0 %v1484_v54  ;;  %2219 = vmatpush3.msra.mxu1 %v1484_v54 }
 0x703   : > { %2072 = vmatprep.subr.mxu0 %v1483_v19  ;;  %2204 = vmatprep.subr.mxu1 %v1483_v19 }
 0x704   : > { %2073 = vmatpush3.msra.mxu0 %v1483_v19  ;;  %2220 = vmatpush3.msra.mxu1 %v1483_v19 }
 0x705   : > { %2074 = vmatprep.subr.mxu0 %v1482_v13  ;;  %2205 = vmatprep.subr.mxu1 %v1482_v13 }
 0x706   : > { %2075 = vmatpush3.msra.mxu0 %v1482_v13  ;;  %2221 = vmatpush3.msra.mxu1 %v1482_v13 }
 0x707   : > { %2076 = vmatprep.subr.mxu0 %v1481_v25  ;;  %2206 = vmatprep.subr.mxu1 %v1481_v25 }
 0x708   : > { %2077 = vmatpush3.msra.mxu0 %v1481_v25  ;;  %2222 = vmatpush3.msra.mxu1 %v1481_v25 }
 0x709   : > { %2078 = vmatprep.subr.mxu0 %v1480_v26  ;;  %2207 = vmatprep.subr.mxu1 %v1480_v26 }
 0x70a   : > { %2079 = vmatpush3.msra.mxu0 %v1480_v26  ;;  %2223 = vmatpush3.msra.mxu1 %v1480_v26 }
 0x70b   : > { %2080 = vmatprep.subr.mxu0 %v1479_v50  ;;  %2208 = vmatprep.subr.mxu1 %v1479_v50 }
 0x70c   : > { %2081 = vmatpush3.msra.mxu0 %v1479_v50  ;;  %2224 = vmatpush3.msra.mxu1 %v1479_v50 }
 0x70d   : > { %2082 = vmatprep.subr.mxu0 %v1478_v8  ;;  %2209 = vmatprep.subr.mxu1 %v1478_v8 }
 0x70e   : > { %2083 = vmatpush3.msra.mxu0 %v1478_v8  ;;  %2225 = vmatpush3.msra.mxu1 %v1478_v8 }
 0x70f   : > { %2084 = vmatprep.subr.mxu0 %v1477_v61  ;;  %2210 = vmatprep.subr.mxu1 %v1477_v61 }
 0x710   : > { %2085 = vmatpush3.msra.mxu0 %v1477_v61  ;;  %2226 = vmatpush3.msra.mxu1 %v1477_v61 }
 0x711   : > { %2086 = vmatprep.subr.mxu0 %v1476_v14  ;;  %2211 = vmatprep.subr.mxu1 %v1476_v14 }
 0x712   : > { %2087 = vmatpush3.msra.mxu0 %v1476_v14  ;;  %2227 = vmatpush3.msra.mxu1 %v1476_v14 }
 0x778   : > { %v1347_v12 = vpop.xlane.xlu0 %1346  ;;  %v1349_v16 = vpop.xlane.xlu1 %1348 }
 0x779   : > { %v1362_v58 = vmul.f32 0.0078125, %v1347_v12  ;;  %v1363_v9 = vmul.f32 0.0078125, %v1349_v16 }
 0x77b   : > { %v3440_v30 = vsub.f32 %v1338_v11, %v1362_v58  ;;  %v3442_v20 = vsub.f32 %v1339_v2, %v1363_v9 }
 0x77c   : > { %v1355_v32 = vpop.xlane.xlu0 %1354  ;;  %v1357_v28 = vpop.xlane.xlu1 %1356 }
 0x77d   : > { %v1366_v35 = vmul.f32 0.0078125, %v1355_v32  ;;  %v1378_v33 = vmul.f32 %v3440_v30, %v3440_v30  ;;  %v1367_v37 = vmul.f32 0.0078125, %v1357_v28  ;;  %v1379_v31 = vmul.f32 %v3442_v20, %v3442_v20 }
 0x77f   : > { %v3446_v29 = vsub.f32 %v1342_v3, %v1366_v35  ;;  %1386 = vadd.xlane.f32.xlu0 %v1378_v33  ;;  %v3448_v27 = vsub.f32 %v1343_v17, %v1367_v37  ;;  %v1819_v35 = vld [vmem:[%s3677_s1] ss:$0 sm:$0xff] }
 0x780   : > { %v1351_v36 = vpop.xlane.xlu0 %1350  ;;  %v1359_v34 = vpop.xlane.xlu1 %1358 }
 0x781   : > { %v1364_v38 = vmul.f32 0.0078125, %v1351_v36  ;;  %v1382_v39 = vmul.f32 %v3446_v29, %v3446_v29  ;;  %v1368_v40 = vmul.f32 0.0078125, %v1359_v34  ;;  %v1383_v43 = vmul.f32 %v3448_v27, %v3448_v27 }
 0x783   : > { %v3454_v41 = vsub.f32 %v1340_v4, %v1364_v38  ;;  %1388 = vadd.xlane.f32.xlu0 %v1379_v31  ;;  %1394 = vadd.xlane.f32.xlu1 %v1382_v39  ;;  %v3456_v42 = vsub.f32 %v1344_v59, %v1368_v40  ;;  %v1820_v31 = vld [vmem:[%s3677_s1 + $0x1] ss:$0 sm:$0xff] }
 0x784   : > { %v1353_v44 = vpop.xlane.xlu0 %1352  ;;  %v1361_v45 = vpop.xlane.xlu1 %1360 }
 0x785   : > { %v1365_v46 = vmul.f32 0.0078125, %v1353_v44  ;;  %v1380_v47 = vmul.f32 %v3454_v41, %v3454_v41  ;;  %v1369_v48 = vmul.f32 0.0078125, %v1361_v45  ;;  %v1384_v51 = vmul.f32 %v3456_v42, %v3456_v42 }
 0x787   : > { %v3462_v49 = vsub.f32 %v1341_v5, %v1365_v46  ;;  %1396 = vadd.xlane.f32.xlu1 %v1383_v43  ;;  %1390 = vadd.xlane.f32.xlu0 %v1380_v47  ;;  %v3464_v55 = vsub.f32 %v1345_v18, %v1369_v48 }
 0x789   : > { %v1381_v57 = vmul.f32 %v3462_v49, %v3462_v49  ;;  %v1385_v22 = vmul.f32 %v3464_v55, %v3464_v55 }
 0x78b   : > { %1398 = vadd.xlane.f32.xlu1 %v1384_v51  ;;  %1392 = vadd.xlane.f32.xlu0 %v1381_v57 }
 0x78f   : > { %1400 = vadd.xlane.f32.xlu1 %v1385_v22 }
 0x808   : > { %v1387_v62 = vpop.xlane.xlu0 %1386 }
 0x809   : > { %v1402_v63 = vmul.f32 0.0078125, %v1387_v62 }
 0x80b   : > { %v1410_v15 = vadd.f32 1e-05, %v1402_v63 }
 0x80c   : > { %v1395_v60 = vpop.xlane.xlu1 %1394  ;;  %v1389_v52 = vpop.xlane.xlu0 %1388 }
 0x80d   : > { %2458 = vrsqrt.f32 %v1410_v15  ;;  %v1406_v0 = vmul.f32 0.0078125, %v1395_v60  ;;  %v1403_v10 = vmul.f32 0.0078125, %v1389_v52 }
 0x80f   : > { %v1414_v1 = vadd.f32 1e-05, %v1406_v0  ;;  %v1411_v11 = vadd.f32 1e-05, %v1403_v10 }
 0x810   : > { %v1397_v2 = vpop.xlane.xlu1 %1396  ;;  %v1391_v3 = vpop.xlane.xlu0 %1390 }
 0x811   : > { %2460 = vrsqrt.f32 %v1414_v1  ;;  %v1407_v17 = vmul.f32 0.0078125, %v1397_v2  ;;  %v1404_v4 = vmul.f32 0.0078125, %v1391_v3 }
 0x812   : > { %2462 = vrsqrt.f32 %v1411_v11 }
 0x813   : > { %v1415_v59 = vadd.f32 1e-05, %v1407_v17  ;;  %v1412_v5 = vadd.f32 1e-05, %v1404_v4 }
 0x814   : > { %v1399_v18 = vpop.xlane.xlu1 %1398  ;;  %v1393_v6 = vpop.xlane.xlu0 %1392 }
 0x815   : > { %2464 = vrsqrt.f32 %v1415_v59  ;;  %v1408_v7 = vmul.f32 0.0078125, %v1399_v18  ;;  %v1405_v12 = vmul.f32 0.0078125, %v1393_v6 }
 0x816   : > { %2466 = vrsqrt.f32 %v1412_v5 }
 0x817   : > { %v1416_v16 = vadd.f32 1e-05, %v1408_v7  ;;  %v1413_v58 = vadd.f32 1e-05, %v1405_v12 }
 0x818   : > { %v1401_v9 = vpop.xlane.xlu1 %1400 }
 0x819   : > { %2468 = vrsqrt.f32 %v1416_v16  ;;  %v1409_v32 = vmul.f32 0.0078125, %v1401_v9 }
 0x81a   : > { %v2459_v28 = vpop.eup %2458  ;;  %2470 = vrsqrt.f32 %v1413_v58 }
 0x81b   : > { %v1417_v33 = vadd.f32 1e-05, %v1409_v32  ;;  %v1428_v37 = vmul.f32 %v2459_v28, %v3440_v30 }
 0x81d   : > { %2472 = vrsqrt.f32 %v1417_v33  ;;  %v1440_v36 = vmul.f32 %v1819_v35, %v1428_v37 }
 0x81e   : > { %v2461_v34 = vpop.eup %2460 }
 0x81f   : > { %v2463_v38 = vpop.eup %2462  ;;  %v1452_v39 = vadd.f32 %v1820_v31, %v1440_v36  ;;  %v1432_v40 = vmul.f32 %v2461_v34, %v3446_v29 }
 0x820   : > { %v1429_v43 = vmul.f32 %v2463_v38, %v3442_v20 }
 0x821   : > { %2088 = vmatprep.mubr.f32.mxu0 %v1452_v39  ;;  %v1444_v44 = vmul.f32 %v1819_v35, %v1432_v40 }
 0x822   : > { %v2465_v45 = vpop.eup %2464  ;;  %v1441_v46 = vmul.f32 %v1819_v35, %v1429_v43 }
 0x823   : > { %v2467_v47 = vpop.eup %2466  ;;  %v1456_v48 = vadd.f32 %v1820_v31, %v1444_v44  ;;  %v1433_v30 = vmul.f32 %v2465_v45, %v3448_v27 }
 0x824   : > { %v1453_v51 = vadd.f32 %v1820_v31, %v1441_v46  ;;  %v1430_v56 = vmul.f32 %v2467_v47, %v3454_v41 }
 0x825   : > { %2094 = vmatprep.mubr.f32.mxu1 %v1456_v48  ;;  %v1445_v57 = vmul.f32 %v1819_v35, %v1433_v30 }
 0x826   : > { %v2469_v21 = vpop.eup %2468  ;;  %2089 = vmatmul.mubr.f32.vlgmr.msra.gmra.mxu0 %v1453_v51  ;;  %v1442_v22 = vmul.f32 %v1819_v35, %v1430_v56 }
 0x827   : > { %v2471_v53 = vpop.eup %2470  ;;  %v1457_v29 = vadd.f32 %v1820_v31, %v1445_v57  ;;  %v1434_v20 = vmul.f32 %v2469_v21, %v3456_v42 }
 0x828   : > { %v1454_v23 = vadd.f32 %v1820_v31, %v1442_v22  ;;  %v1431_v24 = vmul.f32 %v2471_v53, %v3462_v49 }
 0x829   : > { %2095 = vmatmul.mubr.f32.vlgmr.msra.gmra.mxu1 %v1457_v29  ;;  %v1446_v54 = vmul.f32 %v1819_v35, %v1434_v20 }
 0x82a   : > { %v2473_v27 = vpop.eup %2472  ;;  %2091 = vmatprep.mubr.f32.mxu0 %v1454_v23  ;;  %v1443_v41 = vmul.f32 %v1819_v35, %v1431_v24 }
 0x82b   : > { %v1458_v19 = vadd.f32 %v1820_v31, %v1446_v54  ;;  %v1435_v13 = vmul.f32 %v2473_v27, %v3464_v55 }
 0x82c   : > { %v1455_v25 = vadd.f32 %v1820_v31, %v1443_v41 }
 0x82d   : > { %2097 = vmatprep.mubr.f32.mxu1 %v1458_v19  ;;  %v1447_v42 = vmul.f32 %v1819_v35, %v1435_v13 }
 0x82e   : > { %2092 = vmatmul.mubr.f32.gmra.mxu0 %v1455_v25 }
 0x82f   : > { %v1459_v26 = vadd.f32 %v1820_v31, %v1447_v42 }
 0x831   : > { %2098 = vmatmul.mubr.f32.gmra.mxu1 %v1459_v26 }
 0x8e6   : > { %v2090_v49 = vpop.f32.mrf.mxu0 }
 0x8e7   : > { %1598 = vst [vmem:[%s3056_s5 + $0x8] sm:$0xff] %v2090_v49 }
 0x8e8   : > { %v1558_v50 = vpop.f32.mrf.mxu0 }
 0x8e9   : > { %1597 = vst [vmem:[%s3056_s5] sm:$0xff] %v1558_v50  ;;  %v2096_v8 = vpop.f32.mrf.mxu1 }
 0x8ea   : > { %1602 = vst [vmem:[%s3056_s5 + $0x28] sm:$0xff] %v2096_v8 }
 0x8eb   : > { %v1578_v61 = vpop.f32.mrf.mxu1 }
 0x8ec   : > { %1601 = vst [vmem:[%s3056_s5 + $0x20] sm:$0xff] %v1578_v61 }
 0x8ee   : > { %v2093_v14 = vpop.f32.mrf.mxu0 }
 0x8ef   : > { %1600 = vst [vmem:[%s3056_s5 + $0x18] sm:$0xff] %v2093_v14 }
 0x8f0   : > { %v1568_v55 = vpop.f32.mrf.mxu0 }
 0x8f1   : > { %1599 = vst [vmem:[%s3056_s5 + $0x10] sm:$0xff] %v1568_v55  ;;  %v2099_v62 = vpop.f32.mrf.mxu1 }
 0x8f2   : > { %1604 = vst [vmem:[%s3056_s5 + $0x38] sm:$0xff] %v2099_v62 }
 0x8f3   : > { %v1588_v63 = vpop.f32.mrf.mxu1 }
 0x8f4   : > { %1603 = vst [vmem:[%s3056_s5 + $0x30] sm:$0xff] %v1588_v63 }
 0x8f5 PF: > { %s3678_s13 = sld [smem:[#allocation24_spill]]  ;;  %s1621_s19 = sshll.u32 %s3056_s5, 4  ;;  %s3497_s19 = int_to_ptr.vmem [resolvable:$true] %s1621_s19 }
 0x8f6   : > { %s3679_s12 = sld [smem:[#allocation25_spill]]  ;;  %s1606_s14 = scalar_lea.sflag [#allocation9], %s3034_s4 }
 0x8f7   : > { %s3681_s2 = sld [smem:[#allocation40_spill]]  ;;  %s2584_s15 = scalar_lea.vmem %s3497_s19, 1024 }
 0x8f8   : > { %p2585_p0 = scmp.ne.s32.totalorder %s3497_s19, %s2584_s15  ;;  %s2739_s18 = smov [#allocation15]  }
 0x8f9   : > { %s2588_s5 = sshll.u32 %s2739_s18, 4  ;;  %s2589_s5 = int_to_ptr.vmem [resolvable:$false] %s2588_s5 }
 0x8fa   : > { %p2586_p1 = pnand %p2585_p0, %p2971_p7  ;;  %s2590_s6 = scalar_lea.vmem %s2589_s5, 2048 }
 0x8fb   : > { %s1822_s3 = sshll.u32 %s3678_s13, 3  ;;  %p2591_p11 = scmp.lt.s32.totalorder %s3497_s19, %s2589_s5 }
 0x8fc   : > { %s1823_s24 = sshll.u32 %s3679_s12, 4  ;;  %p2587_p8 = pneg %p2586_p1 }
 0x8fd   : > { %s1618_s27 = sadd.s32 %s1823_s24, %s1822_s3  ;;  %p2592_p9 = scmp.lt.s32.totalorder %s2590_s6, %s2584_s15 }
 0x8fe   : > { %s1824_s20 = sshll.u32 %s1618_s27, 7 }
 0x8ff   : > { %s3502_s17 = scalar_lea.hbm %s3681_s2, %s1824_s20  ;;  %p2593_p13 = por %p2592_p9, %p2591_p11 }
 0x901   : > { %p2594_p12 = pnand %p2593_p13, %p2587_p8 }
 0x903   : > { %2597 = shalt.err (!%p2594_p12)
}
 0x904   : > { %s2598_s22 = scalar_lea.hbm %s3502_s17, 1024  ;;  %s2602_s3 = scalar_lea.hbm %s3681_s2, 4096 }
 0x905   : > { %p2599_p6 = scmp.ne.s32.totalorder %s3502_s17, %s2598_s22  ;;  %p2603_p3 = scmp.lt.s32.totalorder %s3502_s17, %s3681_s2 }
 0x906   : > { %p2604_p2 = scmp.lt.s32.totalorder %s2602_s3, %s2598_s22 }
 0x907   : > { %p2600_p4 = pnand %p2599_p6, %p2971_p7 }
 0x908   : > { %p2605_p10 = por %p2604_p2, %p2603_p3 }
 0x909   : > { %p2601_p5 = pneg %p2600_p4 }
 0x90b   : > { %p2606_p0 = pnand %p2605_p10, %p2601_p5 }
 0x90d   : > { %2609 = shalt.err (!%p2606_p0)
}
 0x90e   : > { %s2740_s20 = smov 128   ;;  %s2741_s7 = smov 8  }
 0x90f   : > { %2238 = dma.vmem_to_hbm [thread:$0]  (%p2971_p7), %s3497_s19, 1024, %s3502_s17, %s1606_s14, %s2740_s20, %s2740_s20, %s2741_s7  }
 0x910 PF: > { %s3682_s25 = sld [smem:[#allocation21_spill]]  ;;  %p2261_p1 = scmp.ge.s32.totalorder %s2728_s9, 2 }
 0x911   : > { %s3683_s15 = sld [smem:[#allocation31_spill]] }
 0x916   : > { %s1636_s18 = sand.u32 1, %s3682_s25  }
 0x917   : > { %p3684_p8 = scmp.ne.s32.totalorder %s3683_s15, 0  ;;  %s1637_s5 = scalar_lea.sflag [#allocation9], %s1636_s18 }
 0x919   : > { %p2255_p11 = pnand %p2261_p1, %p3684_p8 }
 0x91b   : > { %p2256_p9 = pneg %p2255_p11 }
 0x91d   : > { %2675 = dma.done.wait (%p2256_p9), %s1637_s5, 1024  }
 0x91e   : > { %2677 = vsyncadd (%p2256_p9), %s1637_s5, 4294966272  ;;  %s26_s9 = sadd.s32 1, %s2728_s9   ;;  %s3686_s4 = sld [smem:[#allocation20_spill]] }
 0x91f   : > { %p3532_p13 = scmp.ge.s32.totalorder %s26_s9, 10   ;;  %s3687_s29 = smov %s2993_s21 }
 0x920   : > { %s3688_s24 = sld [smem:[#allocation22_spill]]  ;;  %s3692_s22 = smov %s2688_s23 }
 0x921   : > { %s3689_s19 = sld [smem:[#allocation26_spill]]  ;;  %s3693_s23 = smov %s3687_s29 }
 0x922   : > { %s3690_s7 = sld [smem:[#allocation33_spill]]  ;;  %s3694_s25 = smov %s2700_s26 }
 0x923   : > { %s3695_s26 = smov %s2988_s28  ;;  %s3696_s27 = smov %s2716_s30 }
 0x924   : > { %s3691_s21 = smov %s3686_s4  ;;  %s3698_s29 = smov %s2724_s8 }
 0x925   : > { %s3699_s30 = smov %s3702_s10  ;;  %s3700_s8 = smov %s3710_s11 }
 0x926   :  { %25 = sbr.rel (!%p3532_p13) target bundleno = 20 (0x14), region = 140 }
 0x927   : > { %s3697_s28 = smov %s3689_s19 }
 0x92b   :  { %1642 = vsyncpa [#allocation8], 1 }
 0x92c   :  { %1644 = vsyncpa [#allocation8 + $0x1], 1 }
 0x92d   :  { %1645 = vsyncpa [#allocation11], 1 }
 0x92e   :  { %1647 = vsyncpa [#allocation11 + $0x1], 1 }
 0x92f   :  { %1648 = vsyncpa [#allocation14], 1 }
 0x930   :  { %1649 = vsyncpa [#allocation9], 1 }
 0x931   :  { %1651 = vsyncpa [#allocation9 + $0x1], 1 }

</bundles_post_ra>
